<compile_context>
chip_gen: v7x
topology: tpu7x:2x2x1
jax: 0.10.0
libtpu: 0.0.40
codegen_flags: <defaults>
</compile_context>

<pallas_src>
import functools

import jax
import jax.numpy as jnp
from jax.experimental import pallas as pl
from jax.experimental.pallas import tpu as pltpu


# -----------------------------------------------------------------------------
# Part 1: GQNN_R forward pass kernel
# -----------------------------------------------------------------------------
def _gqnn_r_fwd_kernel(xa_ref, a_ref, wl1_ref, wr1_ref, b1_ref,
                       wl2_ref, wr2_ref, b2_ref, wfc_ref, bfc_ref, out_ref):
    xa = xa_ref[...].astype(jnp.float32)      # (N, in_dim+1) tau-augmented feats
    a = a_ref[...].astype(jnp.float32)        # (N, N) row-normalised adjacency

    # SAGEConv layer 1 (mean aggregation): relu((A @ x) @ Wl + x @ Wr + b).
    # Computed as A @ (x @ Wl) so both MXU passes keep lane-width = hidden.
    m1 = jnp.dot(xa, wl1_ref[...], preferred_element_type=jnp.float32)
    h1 = jnp.maximum(
        jnp.dot(a, m1, preferred_element_type=jnp.float32)
        + jnp.dot(xa, wr1_ref[...], preferred_element_type=jnp.float32)
        + b1_ref[...], 0.0)

    # SAGEConv layer 2.
    m2 = jnp.dot(h1, wl2_ref[...], preferred_element_type=jnp.float32)
    h2 = jnp.maximum(
        jnp.dot(a, m2, preferred_element_type=jnp.float32)
        + jnp.dot(h1, wr2_ref[...], preferred_element_type=jnp.float32)
        + b2_ref[...], 0.0)

    # fc head (hidden -> 1): broadcast-mul + lane reduce (avoids a 1-lane-wide
    # MXU matmul).
    out = jnp.sum(h2 * wfc_ref[...], axis=1, keepdims=True) + bfc_ref[...]
    out_ref[...] = out.astype(out_ref.dtype)


def build_mean_adjacency(edge_index, num_nodes, dtype=jnp.float32):
    """Row-normalised dense adjacency for mean-aggregation SAGEConv.
    TODO(synk): plain-JAX scatter-add; a data-dependent scatter has no clean
    Pallas TPU equivalent at these sizes."""
    src = edge_index[0]
    dst = edge_index[1]
    a = jnp.zeros((num_nodes, num_nodes), dtype).at[dst, src].add(1.0)
    deg = jnp.maximum(jnp.sum(a, axis=1, keepdims=True), 1.0)
    return a / deg


def gqnn_r_forward(params, x, a_norm, tau):
    """Pallas forward: augment_features + conv1 + relu + conv2 + relu + fc."""
    n = x.shape[0]
    # augment_features(x, tau): append tau as one constant feature column.
    xa = jnp.concatenate([x, jnp.full((n, 1), tau, x.dtype)], axis=1)
    return pl.pallas_call(
        _gqnn_r_fwd_kernel,
        out_shape=jax.ShapeDtypeStruct((n, 1), jnp.float32),
    )(xa, a_norm, params["wl1"], params["wr1"], params["b1"],
      params["wl2"], params["wr2"], params["b2"],
      params["wfc"], params["bfc"])


def gqnn_r_forward_ref(params, x, a_norm, tau):
    """Pure-JAX reference of the same forward."""
    n = x.shape[0]
    xa = jnp.concatenate([x, jnp.full((n, 1), tau, x.dtype)], axis=1)

    def sage(h, wl, wr, b):
        agg = jnp.dot(a_norm, h, precision="highest")
        return jax.nn.relu(jnp.dot(agg, wl, precision="highest")
                           + jnp.dot(h, wr, precision="highest") + b)

    h1 = sage(xa, params["wl1"], params["wr1"], params["b1"])
    h2 = sage(h1, params["wl2"], params["wr2"], params["b2"])
    return jnp.sum(h2 * params["wfc"], axis=1, keepdims=True) + params["bfc"]


def init_gqnn_params(key, in_dim, hidden_dim):
    f_in = in_dim + 1  # augment_features appends the tau column
    k = jax.random.split(key, 8)

    def dense(kk, fan_in, fan_out):
        return (jax.random.normal(kk, (fan_in, fan_out), jnp.float32)
                / jnp.sqrt(float(fan_in)))

    return {
        "wl1": dense(k[0], f_in, hidden_dim),          # conv1 neighbour weight
        "wr1": dense(k[1], f_in, hidden_dim),          # conv1 self/root weight
        "b1": 0.1 * jax.random.normal(k[2], (1, hidden_dim), jnp.float32),
        "wl2": dense(k[3], hidden_dim, hidden_dim),
        "wr2": dense(k[4], hidden_dim, hidden_dim),
        "b2": 0.1 * jax.random.normal(k[5], (1, hidden_dim), jnp.float32),
        "wfc": (jax.random.normal(k[6], (1, hidden_dim), jnp.float32)
                / jnp.sqrt(float(hidden_dim))),
        "bfc": 0.1 * jax.random.normal(k[7], (1, 1), jnp.float32),
    }


# -----------------------------------------------------------------------------
# Part 2: RQR quantile loss kernel (HBM-streaming reduction)
# -----------------------------------------------------------------------------
LANES = 128
MAX_TILE_ROWS = 2048                 # 2048*128 f32 = 1 MiB per stream per block
NUM_CORES = 2                        # leading "parallel" axis (v7x megacore)
VMEM_LIMIT_BYTES = 48 * 1024 * 1024  # above v5e's 16 MiB / v6e-v7x's 32 MiB
                                     # scoped defaults, below v7x's 64 MiB phys.


def _rqr_terms(q1, q2, t, target_q, lambda_factor, order_penalty):
    diff1 = t - q1
    diff2 = t - q2
    width = q2 - q1
    rqr = jnp.maximum(diff1 * diff2 * (target_q + 2.0 * lambda_factor),
                      diff1 * diff2 * (target_q + 2.0 * lambda_factor - 1.0))
    return (rqr + 0.5 * lambda_factor * width * width
            + order_penalty * jnp.maximum(q1 - q2, 0.0))


def _rqr_kernel(q1_ref, q2_ref, t_ref, out_ref, acc_ref, *,
                target_q, lambda_factor, order_penalty,
                valid_rows, tile_rows, steps_per_core):
    c = pl.program_id(0)                       # core-split index ("parallel")
    i = pl.program_id(1)                       # per-core step ("arbitrary")
    g = c * steps_per_core + i                 # unclamped global block index

    @pl.when(i == 0)
    def _():
        acc_ref[...] = jnp.zeros_like(acc_ref)

    # In-kernel upcast: bf16 inputs stream at half the HBM bytes.
    q1 = q1_ref[...].astype(jnp.float32)
    q2 = q2_ref[...].astype(jnp.float32)
    t = t_ref[...].astype(jnp.float32)

    diff1 = t - q1
    diff2 = t - q2
    width = q2 - q1
    prod = diff1 * diff2

    c_hi = jnp.float32(target_q + 2.0 * lambda_factor)
    c_lo = jnp.float32(target_q + 2.0 * lambda_factor - 1.0)
    # c_hi = c_lo + 1  =>  max(p*c_hi, p*c_lo) == p * (c_hi if p>=0 else c_lo):
    # one select + one mul instead of two muls + max (VALU trim).
    rqr = prod * jnp.where(prod >= 0.0, c_hi, c_lo)
    width_loss = jnp.float32(0.5 * lambda_factor) * width * width
    order_term = jnp.float32(order_penalty) * jnp.maximum(q1 - q2, 0.0)
    contrib = rqr + width_loss + order_term            # (tile_rows, LANES)

    # Full-width accumulator: one throughput-bound vreg-wise add per step.
    # Mask (a select, so NaN/Inf in padded rows cannot leak) only on blocks
    # that overrun the valid rows: the genuinely-partial last block and the
    # clamped duplicate blocks of the second core.
    overruns = (g + 1) * tile_rows > valid_rows

    @pl.when((g + 1) * tile_rows <= valid_rows)
    def _():
        acc_ref[...] += contrib

    @pl.when(overruns)
    def _():
        row = g * tile_rows + jax.lax.broadcasted_iota(
            jnp.int32, (tile_rows, LANES), 0)
        acc_ref[...] += jnp.where(row < valid_rows, contrib, jnp.float32(0.0))

    @pl.when(i == steps_per_core - 1)
    def _():
        # Single cross-lane/sublane reduce per core; per-core partial SUM.
        out_ref[0, 0] = jnp.sum(acc_ref[...])


def rqr_loss_pallas(q1, q2, target, *, target_q=0.9, lambda_factor=1.0,
                    order_penalty=1.0):
    """RQR loss. q1, q2, target: 1-D arrays of equal length (f32 or bf16).
    q1/q2 are taken as separate vectors (what two forward passes produce), so
    no (N,2)->(2,N) transpose / column gather is ever materialised."""
    assert q1.ndim == 1 and q1.shape == q2.shape == target.shape
    n = int(q1.shape[0])
    n_main = (n // LANES) * LANES
    tail = n - n_main

    total = jnp.float32(0.0)

    if n_main:
        rows = n_main // LANES

        def fold(v):
            # Lane-aligned N: pure metadata reshape of the contiguous buffer.
            # Ragged N: contiguous-prefix slice (no jnp.pad round-trip that
            # would write + re-read padded copies of all three streams).
            v = v if tail == 0 else v[:n_main]
            return v.reshape(rows, LANES)

        q1m, q2m, tm = fold(q1), fold(q2), fold(target)

        tile_rows = rows if rows < 8 else min(MAX_TILE_ROWS, (rows // 8) * 8)
        num_steps = pl.cdiv(rows, tile_rows)
        steps_per_core = pl.cdiv(num_steps, NUM_CORES)

        # Clamp duplicate trailing blocks of the second core into range; their
        # contribution is zeroed by the in-kernel row mask.
        def in_map(c, i):
            return (jnp.minimum(c * steps_per_core + i, num_steps - 1), 0)

        kernel = functools.partial(
            _rqr_kernel,
            target_q=float(target_q),
            lambda_factor=float(lambda_factor),
            order_penalty=float(order_penalty),
            valid_rows=int(rows),
            tile_rows=int(tile_rows),
            steps_per_core=int(steps_per_core),
        )

        partials = pl.pallas_call(
            kernel,
            out_shape=jax.ShapeDtypeStruct((NUM_CORES, 1), jnp.float32),
            grid_spec=pltpu.PrefetchScalarGridSpec(
                num_scalar_prefetch=0,
                grid=(NUM_CORES, steps_per_core),
                in_specs=[
                    pl.BlockSpec((tile_rows, LANES), in_map),
                    pl.BlockSpec((tile_rows, LANES), in_map),
                    pl.BlockSpec((tile_rows, LANES), in_map),
                ],
                out_specs=pl.BlockSpec((1, 1), lambda c, i: (c, 0),
                                       memory_space=pltpu.SMEM),
                scratch_shapes=[pltpu.VMEM((tile_rows, LANES), jnp.float32)],
            ),
            compiler_params=pltpu.CompilerParams(
                dimension_semantics=("parallel", "arbitrary"),
                vmem_limit_bytes=VMEM_LIMIT_BYTES),
        )(q1m, q2m, tm)
        total = total + jnp.sum(partials)

    if tail:
        # <=127 ragged elements: plain jnp wrapper-side instead of padding all
        # three HBM streams.
        tq1 = q1[n_main:].astype(jnp.float32)
        tq2 = q2[n_main:].astype(jnp.float32)
        tt = target[n_main:].astype(jnp.float32)
        total = total + jnp.sum(
            _rqr_terms(tq1, tq2, tt, float(target_q), float(lambda_factor),
                       float(order_penalty)))

    return total / jnp.float32(n)


def rqr_loss_pallas_preds(preds, target, **kwargs):
    """Compatibility path for the PyTorch (N, 2) layout (materialises two
    column gathers; prefer passing q1/q2 separately)."""
    return rqr_loss_pallas(preds[:, 0], preds[:, 1], target, **kwargs)


def rqr_loss_ref(q1, q2, target, *, target_q=0.9, lambda_factor=1.0,
                 order_penalty=1.0):
    q1 = q1.astype(jnp.float32)
    q2 = q2.astype(jnp.float32)
    t = target.astype(jnp.float32)
    return jnp.mean(_rqr_terms(q1, q2, t, target_q, lambda_factor,
                               order_penalty))


# -----------------------------------------------------------------------------
# Demo / self-check
# -----------------------------------------------------------------------------
if __name__ == "__main__":
    key = jax.random.PRNGKey(0)
    ks = jax.random.split(key, 8)

    # --- GQNN_R forward on a small graph -------------------------------------
    n_nodes, in_dim, hidden_dim, n_edges = 256, 7, 32, 1024
    x = jax.random.normal(ks[0], (n_nodes, in_dim), jnp.float32)
    edge_index = jax.random.randint(ks[1], (2, n_edges), 0, n_nodes)
    target = jax.random.normal(ks[2], (n_nodes,), jnp.float32)

    params = init_gqnn_params(ks[3], in_dim, hidden_dim)
    a_norm = build_mean_adjacency(edge_index, n_nodes)

    tau_lo, tau_hi = 0.1, 0.9
    q_lo = jax.block_until_ready(gqnn_r_forward(params, x, a_norm, tau_lo))
    q_hi = jax.block_until_ready(gqnn_r_forward(params, x, a_norm, tau_hi))

    q_lo_ref = gqnn_r_forward_ref(params, x, a_norm, tau_lo)
    q_hi_ref = gqnn_r_forward_ref(params, x, a_norm, tau_hi)
    assert jnp.allclose(q_lo, q_lo_ref, rtol=1e-3, atol=1e-3), "fwd lo mismatch"
    assert jnp.allclose(q_hi, q_hi_ref, rtol=1e-3, atol=1e-3), "fwd hi mismatch"

    # --- RQR loss on the model's two quantile heads (N = 256) ----------------
    loss = jax.block_until_ready(rqr_loss_pallas(q_lo[:, 0], q_hi[:, 0], target))
    loss_ref = rqr_loss_ref(q_lo[:, 0], q_hi[:, 0], target)
    assert jnp.allclose(loss, loss_ref, rtol=1e-3, atol=1e-3), (loss, loss_ref)

    # --- Larger lane-aligned case: exercises 2048-row tiles, multi-step per
    #     core, the partial-block mask and the clamped duplicate block --------
    n_big = 10243 * LANES                    # 128-aligned, rows = 2*2048 + ...
    q1b = jax.random.normal(ks[4], (n_big,), jnp.float32)
    q2b = jax.random.normal(ks[5], (n_big,), jnp.float32)
    tb = jax.random.normal(ks[6], (n_big,), jnp.float32)
    lb = jax.block_until_ready(rqr_loss_pallas(q1b, q2b, tb))
    lb_ref = rqr_loss_ref(q1b, q2b, tb)
    assert jnp.allclose(lb, lb_ref, rtol=1e-3, atol=1e-3), (lb, lb_ref)

    # bf16 inputs stream at half the HBM bytes; kernel upcasts in VMEM.
    l16 = jax.block_until_ready(rqr_loss_pallas(q1b.astype(jnp.bfloat16),
                                                q2b.astype(jnp.bfloat16),
                                                tb.astype(jnp.bfloat16)))
    l16_ref = rqr_loss_ref(q1b.astype(jnp.bfloat16), q2b.astype(jnp.bfloat16),
                           tb.astype(jnp.bfloat16))
    assert jnp.allclose(l16, l16_ref, rtol=1e-3, atol=1e-3), (l16, l16_ref)

    # --- Ragged N (not lane-aligned): tail handled wrapper-side, no jnp.pad --
    n_rag = 1000
    lr = jax.block_until_ready(
        rqr_loss_pallas(q1b[:n_rag], q2b[:n_rag], tb[:n_rag]))
    lr_ref = rqr_loss_ref(q1b[:n_rag], q2b[:n_rag], tb[:n_rag])
    assert jnp.allclose(lr, lr_ref, rtol=1e-3, atol=1e-3), (lr, lr_ref)

    print("KERNEL_OK")
</pallas_src>

<mosaic_0001>
module attributes {stable_mosaic.version = 11 : i64} {
  func.func @_gqnn_r_fwd_kernel(%arg0: memref<256x8xf32, #tpu.memory_space<vmem>>, %arg1: memref<256x256xf32, #tpu.memory_space<vmem>>, %arg2: memref<8x32xf32, #tpu.memory_space<vmem>>, %arg3: memref<8x32xf32, #tpu.memory_space<vmem>>, %arg4: memref<1x32xf32, #tpu.memory_space<vmem>>, %arg5: memref<32x32xf32, #tpu.memory_space<vmem>>, %arg6: memref<32x32xf32, #tpu.memory_space<vmem>>, %arg7: memref<1x32xf32, #tpu.memory_space<vmem>>, %arg8: memref<1x32xf32, #tpu.memory_space<vmem>>, %arg9: memref<1x1xf32, #tpu.memory_space<vmem>>, %arg10: memref<256x1xf32, #tpu.memory_space<vmem>>) attributes {dimension_semantics = [], scalar_prefetch = 0 : i64, scratch_operands = 0 : i64, tpu.core_type = #tpu.core_type<tc>} {
    %c0 = arith.constant 0 : index
    %c0_0 = arith.constant 0 : index
    %0 = vector.load %arg0[%c0, %c0_0] : memref<256x8xf32, #tpu.memory_space<vmem>>, vector<256x8xf32>
    %c0_1 = arith.constant 0 : index
    %c0_2 = arith.constant 0 : index
    %1 = vector.load %arg1[%c0_1, %c0_2] : memref<256x256xf32, #tpu.memory_space<vmem>>, vector<256x256xf32>
    %c0_3 = arith.constant 0 : index
    %c0_4 = arith.constant 0 : index
    %2 = vector.load %arg2[%c0_3, %c0_4] : memref<8x32xf32, #tpu.memory_space<vmem>>, vector<8x32xf32>
    %cst = arith.constant dense<0.000000e+00> : vector<256x32xf32>
    %3 = tpu.matmul %0, %2, %cst {dimension_numbers = #tpu.dot_dimension_numbers<[1], [0], [0], [1], [0, 0, 1, 1], [], []>} : vector<256x8xf32>, vector<8x32xf32>, vector<256x32xf32> -> vector<256x32xf32>
    %cst_5 = arith.constant dense<0.000000e+00> : vector<256x32xf32>
    %4 = tpu.matmul %1, %3, %cst_5 {dimension_numbers = #tpu.dot_dimension_numbers<[1], [0], [0], [1], [0, 0, 1, 1], [], []>} : vector<256x256xf32>, vector<256x32xf32>, vector<256x32xf32> -> vector<256x32xf32>
    %c0_6 = arith.constant 0 : index
    %c0_7 = arith.constant 0 : index
    %5 = vector.load %arg3[%c0_6, %c0_7] : memref<8x32xf32, #tpu.memory_space<vmem>>, vector<8x32xf32>
    %cst_8 = arith.constant dense<0.000000e+00> : vector<256x32xf32>
    %6 = tpu.matmul %0, %5, %cst_8 {dimension_numbers = #tpu.dot_dimension_numbers<[1], [0], [0], [1], [0, 0, 1, 1], [], []>} : vector<256x8xf32>, vector<8x32xf32>, vector<256x32xf32> -> vector<256x32xf32>
    %7 = arith.addf %4, %6 : vector<256x32xf32>
    %c0_9 = arith.constant 0 : index
    %c0_10 = arith.constant 0 : index
    %8 = vector.load %arg4[%c0_9, %c0_10] : memref<1x32xf32, #tpu.memory_space<vmem>>, vector<1x32xf32>
    %9 = vector.broadcast %8 : vector<1x32xf32> to vector<256x32xf32>
    %10 = arith.addf %7, %9 : vector<256x32xf32>
    %cst_11 = arith.constant 0.000000e+00 : f32
    %11 = vector.broadcast %cst_11 : f32 to vector<256x32xf32>
    %12 = arith.maximumf %10, %11 : vector<256x32xf32>
    %c0_12 = arith.constant 0 : index
    %c0_13 = arith.constant 0 : index
    %13 = vector.load %arg5[%c0_12, %c0_13] : memref<32x32xf32, #tpu.memory_space<vmem>>, vector<32x32xf32>
    %cst_14 = arith.constant dense<0.000000e+00> : vector<256x32xf32>
    %14 = tpu.matmul %12, %13, %cst_14 {dimension_numbers = #tpu.dot_dimension_numbers<[1], [0], [0], [1], [0, 0, 1, 1], [], []>} : vector<256x32xf32>, vector<32x32xf32>, vector<256x32xf32> -> vector<256x32xf32>
    %cst_15 = arith.constant dense<0.000000e+00> : vector<256x32xf32>
    %15 = tpu.matmul %1, %14, %cst_15 {dimension_numbers = #tpu.dot_dimension_numbers<[1], [0], [0], [1], [0, 0, 1, 1], [], []>} : vector<256x256xf32>, vector<256x32xf32>, vector<256x32xf32> -> vector<256x32xf32>
    %c0_16 = arith.constant 0 : index
    %c0_17 = arith.constant 0 : index
    %16 = vector.load %arg6[%c0_16, %c0_17] : memref<32x32xf32, #tpu.memory_space<vmem>>, vector<32x32xf32>
    %cst_18 = arith.constant dense<0.000000e+00> : vector<256x32xf32>
    %17 = tpu.matmul %12, %16, %cst_18 {dimension_numbers = #tpu.dot_dimension_numbers<[1], [0], [0], [1], [0, 0, 1, 1], [], []>} : vector<256x32xf32>, vector<32x32xf32>, vector<256x32xf32> -> vector<256x32xf32>
    %18 = arith.addf %15, %17 : vector<256x32xf32>
    %c0_19 = arith.constant 0 : index
    %c0_20 = arith.constant 0 : index
    %19 = vector.load %arg7[%c0_19, %c0_20] : memref<1x32xf32, #tpu.memory_space<vmem>>, vector<1x32xf32>
    %20 = vector.broadcast %19 : vector<1x32xf32> to vector<256x32xf32>
    %21 = arith.addf %18, %20 : vector<256x32xf32>
    %cst_21 = arith.constant 0.000000e+00 : f32
    %22 = vector.broadcast %cst_21 : f32 to vector<256x32xf32>
    %23 = arith.maximumf %21, %22 : vector<256x32xf32>
    %c0_22 = arith.constant 0 : index
    %c0_23 = arith.constant 0 : index
    %24 = vector.load %arg8[%c0_22, %c0_23] : memref<1x32xf32, #tpu.memory_space<vmem>>, vector<1x32xf32>
    %25 = vector.broadcast %24 : vector<1x32xf32> to vector<256x32xf32>
    %26 = arith.mulf %23, %25 : vector<256x32xf32>
    %cst_24 = arith.constant dense<0.000000e+00> : vector<256xf32>
    %27 = vector.multi_reduction <add>, %26, %cst_24 [1] : vector<256x32xf32> to vector<256xf32>
    %28 = vector.shape_cast %27 : vector<256xf32> to vector<256x1xf32>
    %c0_25 = arith.constant 0 : index
    %c0_26 = arith.constant 0 : index
    %29 = vector.load %arg9[%c0_25, %c0_26] : memref<1x1xf32, #tpu.memory_space<vmem>>, vector<1x1xf32>
    %30 = vector.broadcast %29 : vector<1x1xf32> to vector<256x1xf32>
    %31 = arith.addf %28, %30 : vector<256x1xf32>
    %c0_27 = arith.constant 0 : index
    %c0_28 = arith.constant 0 : index
    %32 = vector.load %arg10[%c0_27, %c0_28] : memref<256x1xf32, #tpu.memory_space<vmem>>, vector<256x1xf32>
    tpu.vector_store %arg10[%c0_27, %c0_28], %31 {strides = array<i32>} : memref<256x1xf32, #tpu.memory_space<vmem>>, vector<256x1xf32>,
    return
  }
}

</mosaic_0001>

<bundles_post_ra>
// kernel: tpu_custom_call.1
= control target key start
LH: loop header
LB: loop body
LE: loop exit
PB: predicated region body
PF: predicated region fallthrough
CT: control target
= control target key end

     0   :  { %s3969_s0 = inlined_call_operand.vmem [shape: f32[256,8], index: 0, kind: input, shape index: {}]   ;;  %s3970_s1 = inlined_call_operand.hbm [shape: f32[256,256], index: 1, kind: input, shape index: {}]   ;;  %s3971_s2 = inlined_call_operand.vmem [shape: f32[8,32], index: 2, kind: input, shape index: {}]   ;;  %s3972_s3 = inlined_call_operand.vmem [shape: f32[8,32], index: 3, kind: input, shape index: {}]   ;;  %s3973_s4 = inlined_call_operand.vmem [shape: f32[1,32], index: 4, kind: input, shape index: {}]   ;;  %s3974_s5 = inlined_call_operand.vmem [shape: f32[32,32], index: 5, kind: input, shape index: {}]   ;;  %s3975_s6 = inlined_call_operand.vmem [shape: f32[32,32], index: 6, kind: input, shape index: {}]   ;;  %s3976_s7 = inlined_call_operand.vmem [shape: f32[1,32], index: 7, kind: input, shape index: {}]   ;;  %s3977_s8 = inlined_call_operand.vmem [shape: f32[1,32], index: 8, kind: input, shape index: {}]   ;;  %s3978_s9 = inlined_call_operand.<no memory space> [shape: f32[1,1], index: 9, kind: input, shape index: {}]   ;;  %s3979_s10 = inlined_call_operand.vmem [shape: f32[256,1], index: 10, kind: output, shape index: {}]  }
   0x1   :  { %v15_v0 = vstv %s3978_s9 }
   0x2   :  { %16 = vst [vmem:[#allocation2] sm:$0x1] %v15_v0 }
   0x3   :  { %17 = vsyncpa [#allocation4], 0  ;;  %s2720_s15 = smov [#allocation3]   ;;  %s2696_s19 = scalar_lea.hbm %s3970_s1, 8192 }
   0x4   :  { %s25_s16 = sshll.u32 %s2720_s15, 4  ;;  %p2697_p0 = scmp.ne.s32.totalorder %s3970_s1, %s2696_s19  ;;  %s26_s16 = int_to_ptr.vmem [resolvable:$true] %s25_s16 }
   0x5   :  { %p2700_p1 = scmp.lt.u32.totalorder %s2696_s19, %s3970_s1 }
   0x7   :  { %p2702_p2 = pnand %p2700_p1, %p2697_p0 }
   0x9   :  { %2705 = shalt.err (!%p2702_p2)
}
   0xa   :  { %s2706_s9 = scalar_lea.vmem %s26_s16, 8192  ;;  %p2711_p4 = scmp.lt.s32.totalorder %s26_s16, %s26_s16 }
   0xb   :  { %p2707_p3 = scmp.ne.s32.totalorder %s26_s16, %s2706_s9  ;;  %p2712_p5 = scmp.lt.s32.totalorder %s2706_s9, %s2706_s9 }
   0xd   :  { %p2713_p6 = por %p2712_p5, %p2711_p4 }
   0xf   :  { %p2714_p7 = pnand %p2713_p6, %p2707_p3 }
  0x11   :  { %2717 = shalt.err (!%p2714_p7)
}
  0x12   :  { %s2721_s24 = smov 256   ;;  %s2722_s25 = smov 16  }
  0x13   :  { %31 = dma.hbm_to_vmem [thread:$0]  %s3970_s1, 8192, %s26_s16, [#allocation4], %s2721_s24, %s2721_s24, %s2722_s25  }
  0x14   :  { %2718 = dma.done.wait [#allocation4], 8192  }
  0x15   :  { %2719 = vsyncadd [#allocation4], 4294959104  ;;  %vm148_vm0 = vcmask 64512   ;;  %v147_v1 = vld [vmem:[%s3971_s2] sm:$0xff]  ;;  %v2803_v3 = vld [vmem:[%s3969_s0 + $0x8] sm:$0xff]  ;;  %v3980_v35 = vmov 0.0|0.0  }
  0x16   :  { %v51_v2 = vld [vmem:[%s3969_s0] sm:$0xff]  ;;  %2325 = vmatprep.subr.mxu0 %v147_v1  ;;  %v2809_v4 = vld [vmem:[%s3969_s0 + $0x10] sm:$0xff]  ;;  %v2819_v5 = vld [vmem:[%s3969_s0 + $0x18] sm:$0xff]  ;;  %vm996_vm1 = vcmask 261120   ;;  %vm2017_vm2 = vcmask 7168  }
  0x17   :  { %2327 = vmatprep.mubr.msk.f32.mxu0 %vm148_vm0, %v51_v2  ;;  %2326 = vmatpush3.msra.mxu0 %v147_v1  ;;  %v2824_v6 = vld [vmem:[%s3969_s0 + $0x20] sm:$0xff]  ;;  %v2833_v7 = vld [vmem:[%s3969_s0 + $0x28] sm:$0xff]  ;;  %v2838_v8 = vld [vmem:[%s3969_s0 + $0x30] sm:$0xff] }
  0x18   :  { %2377 = vmatprep.mubr.msk.f32.mxu1 %vm148_vm0, %v51_v2  ;;  %2328 = vmatmul.mubr.msk.f32.vlgmr.msra.gmra.mrb[0].mxu0 %vm148_vm0, %v2803_v3  ;;  %v58_v9 = vld [vmem:[%s3969_s0 + $0x38] sm:$0xff]  ;;  %v59_v10 = vld [vmem:[%s3969_s0 + $0x40] sm:$0xff]  ;;  %v60_v11 = vld [vmem:[%s3969_s0 + $0x48] sm:$0xff] }
  0x19   :  { %2330 = vmatprep.mubr.msk.f32.mxu0 %vm148_vm0, %v2809_v4  ;;  %v61_v12 = vld [vmem:[%s3969_s0 + $0x50] sm:$0xff]  ;;  %v62_v13 = vld [vmem:[%s3969_s0 + $0x58] sm:$0xff]  ;;  %v63_v14 = vld [vmem:[%s3969_s0 + $0x60] sm:$0xff]  ;;  %2537 = vmatprep.subr.bf16.mxu0 %v3980_v35 }
  0x1a   :  { %v64_v15 = vld [vmem:[%s3969_s0 + $0x68] sm:$0xff]  ;;  %v65_v16 = vld [vmem:[%s3969_s0 + $0x70] sm:$0xff]  ;;  %v66_v17 = vld [vmem:[%s3969_s0 + $0x78] sm:$0xff] }
  0x1b   :  { %v67_v18 = vld [vmem:[%s3969_s0 + $0x80] sm:$0xff]  ;;  %v68_v19 = vld [vmem:[%s3969_s0 + $0x88] sm:$0xff]  ;;  %v69_v20 = vld [vmem:[%s3969_s0 + $0x90] sm:$0xff] }
  0x1c   :  { %2331 = vmatmul.mubr.msk.f32.gmra.mrb[2].mxu0 %vm148_vm0, %v2819_v5  ;;  %v70_v21 = vld [vmem:[%s3969_s0 + $0x98] sm:$0xff]  ;;  %v71_v22 = vld [vmem:[%s3969_s0 + $0xa0] sm:$0xff]  ;;  %v72_v23 = vld [vmem:[%s3969_s0 + $0xa8] sm:$0xff] }
  0x1d   :  { %2333 = vmatprep.mubr.msk.f32.mxu0 %vm148_vm0, %v2824_v6  ;;  %v73_v24 = vld [vmem:[%s3969_s0 + $0xb0] sm:$0xff]  ;;  %v74_v25 = vld [vmem:[%s3969_s0 + $0xb8] sm:$0xff]  ;;  %v75_v26 = vld [vmem:[%s3969_s0 + $0xc0] sm:$0xff] }
  0x1e   :  { %v76_v27 = vld [vmem:[%s3969_s0 + $0xc8] sm:$0xff]  ;;  %v77_v28 = vld [vmem:[%s3969_s0 + $0xd0] sm:$0xff]  ;;  %v78_v29 = vld [vmem:[%s3969_s0 + $0xd8] sm:$0xff] }
  0x1f   :  { %v79_v30 = vld [vmem:[%s3969_s0 + $0xe0] sm:$0xff]  ;;  %v80_v31 = vld [vmem:[%s3969_s0 + $0xe8] sm:$0xff]  ;;  %v81_v32 = vld [vmem:[%s3969_s0 + $0xf0] sm:$0xff] }
  0x20   :  { %2334 = vmatmul.mubr.msk.f32.gmra.mrb[4].mxu0 %vm148_vm0, %v2833_v7  ;;  %v82_v33 = vld [vmem:[%s3969_s0 + $0xf8] sm:$0xff]  ;;  %v470_v34 = vld [vmem:[%s3972_s3] sm:$0xff]  ;;  %v2986_v36 = vld [vmem:[#allocation3 + $0x8] sm:$0xff] }
  0x21   :  { %2336 = vmatprep.mubr.msk.f32.mxu0 %vm148_vm0, %v2838_v8  ;;  %2375 = vmatprep.subr.mxu1 %v470_v34  ;;  %v116_v37 = vld [vmem:[#allocation3 + $0x108] sm:$0xff] }
  0x22   :  { %2376 = vmatpush3.msra.mxu1 %v470_v34  ;;  %v119_v34 = vld [vmem:[#allocation3 + $0x120] sm:$0xff] }
  0x23   :  { %2378 = vmatmul.mubr.msk.f32.vlgmr.msra.gmra.mrb[0].mxu1 %vm148_vm0, %v2803_v3  ;;  %2649 = vmatprep.subr.bf16.mxu1 %v3980_v35 }
  0x24   :  { %2337 = vmatmul.mubr.msk.f32.gmra.mrb[6].mxu0 %vm148_vm0, %v58_v9  ;;  %2380 = vmatprep.mubr.msk.f32.mxu1 %vm148_vm0, %v2809_v4 }
  0x25   :  { %2339 = vmatprep.mubr.msk.f32.mxu0 %vm148_vm0, %v59_v10 }
  0x27   :  { %2381 = vmatmul.mubr.msk.f32.gmra.mrb[2].mxu1 %vm148_vm0, %v2819_v5 }
  0x28   :  { %2340 = vmatmul.mubr.msk.f32.gmra.mrb[8].mxu0 %vm148_vm0, %v60_v11  ;;  %2383 = vmatprep.mubr.msk.f32.mxu1 %vm148_vm0, %v2824_v6 }
  0x29   :  { %2342 = vmatprep.mubr.msk.f32.mxu0 %vm148_vm0, %v61_v12 }
  0x2b   :  { %2384 = vmatmul.mubr.msk.f32.gmra.mrb[4].mxu1 %vm148_vm0, %v2833_v7 }
  0x2c   :  { %2343 = vmatmul.mubr.msk.f32.gmra.mrb[10].mxu0 %vm148_vm0, %v62_v13  ;;  %2386 = vmatprep.mubr.msk.f32.mxu1 %vm148_vm0, %v2838_v8 }
  0x2d   :  { %2345 = vmatprep.mubr.msk.f32.mxu0 %vm148_vm0, %v63_v14 }
  0x2f   :  { %2387 = vmatmul.mubr.msk.f32.gmra.mrb[6].mxu1 %vm148_vm0, %v58_v9 }
  0x30   :  { %2346 = vmatmul.mubr.msk.f32.gmra.mrb[12].mxu0 %vm148_vm0, %v64_v15  ;;  %2389 = vmatprep.mubr.msk.f32.mxu1 %vm148_vm0, %v59_v10 }
  0x31   :  { %2348 = vmatprep.mubr.msk.f32.mxu0 %vm148_vm0, %v65_v16 }
  0x33   :  { %2390 = vmatmul.mubr.msk.f32.gmra.mrb[8].mxu1 %vm148_vm0, %v60_v11 }
  0x34   :  { %2349 = vmatmul.mubr.msk.f32.gmra.mrb[14].mxu0 %vm148_vm0, %v66_v17  ;;  %2392 = vmatprep.mubr.msk.f32.mxu1 %vm148_vm0, %v61_v12 }
  0x35   :  { %2351 = vmatprep.mubr.msk.f32.mxu0 %vm148_vm0, %v67_v18 }
  0x37   :  { %2393 = vmatmul.mubr.msk.f32.gmra.mrb[10].mxu1 %vm148_vm0, %v62_v13 }
  0x38   :  { %2352 = vmatmul.mubr.msk.f32.gmra.mrb[16].mxu0 %vm148_vm0, %v68_v19  ;;  %2395 = vmatprep.mubr.msk.f32.mxu1 %vm148_vm0, %v63_v14 }
  0x39   :  { %2354 = vmatprep.mubr.msk.f32.mxu0 %vm148_vm0, %v69_v20 }
  0x3b   :  { %2396 = vmatmul.mubr.msk.f32.gmra.mrb[12].mxu1 %vm148_vm0, %v64_v15 }
  0x3c   :  { %2355 = vmatmul.mubr.msk.f32.gmra.mrb[18].mxu0 %vm148_vm0, %v70_v21  ;;  %2398 = vmatprep.mubr.msk.f32.mxu1 %vm148_vm0, %v65_v16 }
  0x3d   :  { %2357 = vmatprep.mubr.msk.f32.mxu0 %vm148_vm0, %v71_v22 }
  0x3f   :  { %2399 = vmatmul.mubr.msk.f32.gmra.mrb[14].mxu1 %vm148_vm0, %v66_v17 }
  0x40   :  { %2358 = vmatmul.mubr.msk.f32.gmra.mrb[20].mxu0 %vm148_vm0, %v72_v23  ;;  %2401 = vmatprep.mubr.msk.f32.mxu1 %vm148_vm0, %v67_v18 }
  0x41   :  { %2360 = vmatprep.mubr.msk.f32.mxu0 %vm148_vm0, %v73_v24 }
  0x43   :  { %2402 = vmatmul.mubr.msk.f32.gmra.mrb[16].mxu1 %vm148_vm0, %v68_v19  ;;  %v992_v19 = vld [vmem:[%s3974_s5] sm:$0xff] }
  0x44   :  { %2361 = vmatmul.mubr.msk.f32.gmra.mrb[22].mxu0 %vm148_vm0, %v74_v25  ;;  %2404 = vmatprep.mubr.msk.f32.mxu1 %vm148_vm0, %v69_v20  ;;  %v993_v20 = vld [vmem:[%s3974_s5 + $0x8] sm:$0xff] }
  0x45   :  { %2363 = vmatprep.mubr.msk.f32.mxu0 %vm148_vm0, %v75_v26 }
  0x47   :  { %2405 = vmatmul.mubr.msk.f32.gmra.mrb[18].mxu1 %vm148_vm0, %v70_v21 }
  0x48   :  { %2364 = vmatmul.mubr.msk.f32.gmra.mrb[24].mxu0 %vm148_vm0, %v76_v27  ;;  %2407 = vmatprep.mubr.msk.f32.mxu1 %vm148_vm0, %v71_v22 }
  0x49   :  { %2366 = vmatprep.mubr.msk.f32.mxu0 %vm148_vm0, %v77_v28 }
  0x4b   :  { %2408 = vmatmul.mubr.msk.f32.gmra.mrb[20].mxu1 %vm148_vm0, %v72_v23  ;;  %v2585_v23 = vpack.c.bf16 %v993_v20, %v992_v19  ;;  %v3152_v19 = vld [vmem:[#allocation3 + $0xb0] sm:$0xff] }
  0x4c   :  { %2367 = vmatmul.mubr.msk.f32.gmra.mrb[26].mxu0 %vm148_vm0, %v78_v29  ;;  %2410 = vmatprep.mubr.msk.f32.mxu1 %vm148_vm0, %v73_v24  ;;  %4048 = vst [vmem:[#allocation25_spill] sm:$0xff] %v3152_v19  ;;  %v3154_v20 = vld [vmem:[#allocation3 + $0x1b0] sm:$0xff] }
  0x4d   :  { %2369 = vmatprep.mubr.msk.f32.mxu0 %vm148_vm0, %v79_v30  ;;  %4049 = vst [vmem:[#allocation26_spill] sm:$0xff] %v3154_v20 }
  0x4f   :  { %2411 = vmatmul.mubr.msk.f32.gmra.mrb[22].mxu1 %vm148_vm0, %v74_v25  ;;  %v3025_v25 = vld [vmem:[#allocation3] sm:$0xff] }
  0x50   :  { %2370 = vmatmul.mubr.msk.f32.gmra.mrb[28].mxu0 %vm148_vm0, %v80_v31  ;;  %2413 = vmatprep.mubr.msk.f32.mxu1 %vm148_vm0, %v75_v26  ;;  %v115_v26 = vld [vmem:[#allocation3 + $0x100] sm:$0xff] }
  0x51   :  { %2372 = vmatprep.mubr.msk.f32.mxu0 %vm148_vm0, %v81_v32 }
  0x53   :  { %2414 = vmatmul.mubr.msk.f32.gmra.mrb[24].mxu1 %vm148_vm0, %v76_v27  ;;  %v3027_v27 = vld [vmem:[#allocation3 + $0x18] sm:$0xff] }
  0x54   :  { %2373 = vmatmul.mubr.msk.f32.gmra.mrb[30].mxu0 %vm148_vm0, %v82_v33  ;;  %2416 = vmatprep.mubr.msk.f32.mxu1 %vm148_vm0, %v77_v28  ;;  %v118_v28 = vld [vmem:[#allocation3 + $0x118] sm:$0xff] }
  0x55   :  { %760 = vmatprep.mubr.f32.mxu0 %v2986_v36 }
  0x57   :  { %2417 = vmatmul.mubr.msk.f32.gmra.mrb[26].mxu1 %vm148_vm0, %v78_v29  ;;  %v3032_v29 = vld [vmem:[#allocation3 + $0x10] sm:$0xff] }
  0x58   :  { %2419 = vmatprep.mubr.msk.f32.mxu1 %vm148_vm0, %v79_v30  ;;  %v117_v30 = vld [vmem:[#allocation3 + $0x110] sm:$0xff] }
  0x5b   :  { %2420 = vmatmul.mubr.msk.f32.gmra.mrb[28].mxu1 %vm148_vm0, %v80_v31  ;;  %v3034_v31 = vld [vmem:[#allocation3 + $0x28] sm:$0xff] }
  0x5c   :  { %2422 = vmatprep.mubr.msk.f32.mxu1 %vm148_vm0, %v81_v32  ;;  %v120_v32 = vld [vmem:[#allocation3 + $0x128] sm:$0xff] }
  0x5f   :  { %2423 = vmatmul.mubr.msk.f32.gmra.mrb[30].mxu1 %vm148_vm0, %v82_v33  ;;  %v3038_v33 = vld [vmem:[#allocation3 + $0x20] sm:$0xff] }
  0x60   :  { %840 = vmatprep.mubr.f32.mxu1 %v116_v37  ;;  %v3040_v37 = vld [vmem:[#allocation3 + $0x38] sm:$0xff] }
  0xeb   :  { %v2329_v38 = vpop.f32.mrb[0].mxu0 }
  0xec   :  { %v311_v39 = vpop.f32.mrb[1].mxu0 }
  0xed   :  { %v2538_v40 = vpack.c.bf16 %v2329_v38, %v311_v39  ;;  %v122_v38 = vld [vmem:[#allocation3 + $0x138] sm:$0xff]  ;;  %v3044_v39 = vld [vmem:[#allocation3 + $0x30] sm:$0xff] }
  0xef   :  { %v2332_v41 = vpop.f32.mrb[2].mxu0  ;;  %2539 = vmatpush1.bf16.msra.mxu0 %v2538_v40  ;;  %2665 = vmatpush1.bf16.msra.mxu1 %v2538_v40  ;;  %v121_v40 = vld [vmem:[#allocation3 + $0x130] sm:$0xff] }
  0xf0   :  { %v321_v42 = vpop.f32.mrb[3].mxu0  ;;  %2540 = vmatprep.subr.bf16.mxu0 %v3980_v35  ;;  %2650 = vmatprep.subr.bf16.mxu1 %v3980_v35 }
  0xf1   :  { %v2541_v43 = vpack.c.bf16 %v2332_v41, %v321_v42  ;;  %v3046_v41 = vld [vmem:[#allocation3 + $0x48] sm:$0xff] }
  0xf2   :  { %v124_v42 = vld [vmem:[#allocation3 + $0x148] sm:$0xff] }
  0xf3   :  { %v2335_v44 = vpop.f32.mrb[4].mxu0  ;;  %2542 = vmatpush1.bf16.msra.mxu0 %v2541_v43  ;;  %2666 = vmatpush1.bf16.msra.mxu1 %v2541_v43  ;;  %v3050_v43 = vld [vmem:[#allocation3 + $0x40] sm:$0xff] }
  0xf4   :  { %v331_v45 = vpop.f32.mrb[5].mxu0  ;;  %2543 = vmatprep.subr.bf16.mxu0 %v3980_v35  ;;  %2651 = vmatprep.subr.bf16.mxu1 %v3980_v35 }
  0xf5   :  { %v2544_v46 = vpack.c.bf16 %v2335_v44, %v331_v45  ;;  %v123_v44 = vld [vmem:[#allocation3 + $0x140] sm:$0xff]  ;;  %v3052_v45 = vld [vmem:[#allocation3 + $0x58] sm:$0xff] }
  0xf7   :  { %v2338_v47 = vpop.f32.mrb[6].mxu0  ;;  %2545 = vmatpush1.bf16.msra.mxu0 %v2544_v46  ;;  %2667 = vmatpush1.bf16.msra.mxu1 %v2544_v46  ;;  %v126_v46 = vld [vmem:[#allocation3 + $0x158] sm:$0xff] }
  0xf8   :  { %v341_v48 = vpop.f32.mrb[7].mxu0  ;;  %2546 = vmatprep.subr.bf16.mxu0 %v3980_v35  ;;  %2652 = vmatprep.subr.bf16.mxu1 %v3980_v35 }
  0xf9   :  { %v2547_v49 = vpack.c.bf16 %v2338_v47, %v341_v48  ;;  %v3056_v47 = vld [vmem:[#allocation3 + $0x50] sm:$0xff] }
  0xfa   :  { %v3058_v48 = vld [vmem:[#allocation3 + $0x150] sm:$0xff] }
  0xfb   :  { %v2341_v50 = vpop.f32.mrb[8].mxu0  ;;  %2548 = vmatpush1.bf16.msra.mxu0 %v2547_v49  ;;  %2668 = vmatpush1.bf16.msra.mxu1 %v2547_v49  ;;  %4029 = vst [vmem:[#allocation6_spill] sm:$0xff] %v3058_v48  ;;  %v3060_v49 = vld [vmem:[#allocation3 + $0x68] sm:$0xff] }
  0xfc   :  { %v351_v51 = vpop.f32.mrb[9].mxu0  ;;  %2549 = vmatprep.subr.bf16.mxu0 %v3980_v35  ;;  %2653 = vmatprep.subr.bf16.mxu1 %v3980_v35 }
  0xfd   :  { %v2550_v52 = vpack.c.bf16 %v2341_v50, %v351_v51  ;;  %v3062_v50 = vld [vmem:[#allocation3 + $0x168] sm:$0xff]  ;;  %v3064_v51 = vpop.f32.mrb[0].mxu1 }
  0xfe   :  { %4030 = vst [vmem:[#allocation7_spill] sm:$0xff] %v3062_v50 }
  0xff   :  { %v2344_v53 = vpop.f32.mrb[10].mxu0  ;;  %2551 = vmatpush1.bf16.msra.mxu0 %v2550_v52  ;;  %2669 = vmatpush1.bf16.msra.mxu1 %v2550_v52  ;;  %v3068_v52 = vpop.f32.mrb[1].mxu1 }
 0x100   :  { %v361_v54 = vpop.f32.mrb[11].mxu0  ;;  %2552 = vmatprep.subr.bf16.mxu0 %v3980_v35  ;;  %2654 = vmatprep.subr.bf16.mxu1 %v3980_v35 }
 0x101   :  { %v2553_v55 = vpack.c.bf16 %v2344_v53, %v361_v54  ;;  %v3072_v53 = vld [vmem:[#allocation3 + $0x60] sm:$0xff] }
 0x102   :  { %v3074_v54 = vld [vmem:[#allocation3 + $0x160] sm:$0xff] }
 0x103   :  { %v2347_v56 = vpop.f32.mrb[12].mxu0  ;;  %2554 = vmatpush1.bf16.msra.mxu0 %v2553_v55  ;;  %2670 = vmatpush1.bf16.msra.mxu1 %v2553_v55  ;;  %4031 = vst [vmem:[#allocation8_spill] sm:$0xff] %v3074_v54  ;;  %v3076_v55 = vld [vmem:[#allocation3 + $0x78] sm:$0xff] }
 0x104   :  { %v371_v57 = vpop.f32.mrb[13].mxu0  ;;  %2555 = vmatprep.subr.bf16.mxu0 %v3980_v35  ;;  %2655 = vmatprep.subr.bf16.mxu1 %v3980_v35 }
 0x105   :  { %v2556_v58 = vpack.c.bf16 %v2347_v56, %v371_v57  ;;  %v3078_v56 = vld [vmem:[#allocation3 + $0x178] sm:$0xff]  ;;  %v3080_v57 = vpop.f32.mrb[2].mxu1 }
 0x106   :  { %4032 = vst [vmem:[#allocation9_spill] sm:$0xff] %v3078_v56 }
 0x107   :  { %v2350_v59 = vpop.f32.mrb[14].mxu0  ;;  %2557 = vmatpush1.bf16.msra.mxu0 %v2556_v58  ;;  %2671 = vmatpush1.bf16.msra.mxu1 %v2556_v58  ;;  %v3084_v58 = vpop.f32.mrb[3].mxu1 }
 0x108   :  { %v381_v60 = vpop.f32.mrb[15].mxu0  ;;  %2558 = vmatprep.subr.bf16.mxu0 %v3980_v35  ;;  %2656 = vmatprep.subr.bf16.mxu1 %v3980_v35 }
 0x109   :  { %v2559_v61 = vpack.c.bf16 %v2350_v59, %v381_v60  ;;  %v3088_v59 = vld [vmem:[#allocation3 + $0x70] sm:$0xff] }
 0x10a   :  { %v3090_v60 = vld [vmem:[#allocation3 + $0x170] sm:$0xff] }
 0x10b   :  { %v2353_v62 = vpop.f32.mrb[16].mxu0  ;;  %2560 = vmatpush1.bf16.msra.mxu0 %v2559_v61  ;;  %2672 = vmatpush1.bf16.msra.mxu1 %v2559_v61  ;;  %4033 = vst [vmem:[#allocation10_spill] sm:$0xff] %v3090_v60  ;;  %v3092_v61 = vld [vmem:[#allocation3 + $0x88] sm:$0xff] }
 0x10c   :  { %v391_v63 = vpop.f32.mrb[17].mxu0  ;;  %2561 = vmatprep.subr.bf16.mxu0 %v3980_v35  ;;  %2657 = vmatprep.subr.bf16.mxu1 %v3980_v35  ;;  %4034 = vst [vmem:[#allocation11_spill] sm:$0xff] %v3092_v61 }
 0x10d   :  { %v2562_v0 = vpack.c.bf16 %v2353_v62, %v391_v63  ;;  %v3094_v62 = vld [vmem:[#allocation3 + $0x188] sm:$0xff]  ;;  %v3096_v63 = vpop.f32.mrb[4].mxu1 }
 0x10e   :  { %4035 = vst [vmem:[#allocation12_spill] sm:$0xff] %v3094_v62 }
 0x10f   :  { %v2356_v1 = vpop.f32.mrb[18].mxu0  ;;  %2563 = vmatpush1.bf16.msra.mxu0 %v2562_v0  ;;  %2673 = vmatpush1.bf16.msra.mxu1 %v2562_v0  ;;  %v3100_v0 = vpop.f32.mrb[5].mxu1 }
 0x110   :  { %v401_v2 = vpop.f32.mrb[19].mxu0  ;;  %2564 = vmatprep.subr.bf16.mxu0 %v3980_v35  ;;  %2658 = vmatprep.subr.bf16.mxu1 %v3980_v35 }
 0x111   :  { %v2565_v3 = vpack.c.bf16 %v2356_v1, %v401_v2  ;;  %v3104_v1 = vld [vmem:[#allocation3 + $0x80] sm:$0xff] }
 0x112   :  { %4036 = vst [vmem:[#allocation13_spill] sm:$0xff] %v3104_v1  ;;  %v3106_v2 = vld [vmem:[#allocation3 + $0x180] sm:$0xff] }
 0x113   :  { %v2359_v4 = vpop.f32.mrb[20].mxu0  ;;  %2566 = vmatpush1.bf16.msra.mxu0 %v2565_v3  ;;  %2674 = vmatpush1.bf16.msra.mxu1 %v2565_v3  ;;  %4037 = vst [vmem:[#allocation14_spill] sm:$0xff] %v3106_v2  ;;  %v3108_v3 = vld [vmem:[#allocation3 + $0x98] sm:$0xff] }
 0x114   :  { %v411_v5 = vpop.f32.mrb[21].mxu0  ;;  %2567 = vmatprep.subr.bf16.mxu0 %v3980_v35  ;;  %2659 = vmatprep.subr.bf16.mxu1 %v3980_v35  ;;  %4038 = vst [vmem:[#allocation15_spill] sm:$0xff] %v3108_v3 }
 0x115   :  { %v2568_v6 = vpack.c.bf16 %v2359_v4, %v411_v5  ;;  %v3110_v4 = vld [vmem:[#allocation3 + $0x198] sm:$0xff]  ;;  %v3112_v5 = vpop.f32.mrb[6].mxu1 }
 0x116   :  { %4039 = vst [vmem:[#allocation16_spill] sm:$0xff] %v3110_v4 }
 0x117   :  { %v2362_v7 = vpop.f32.mrb[22].mxu0  ;;  %2569 = vmatpush1.bf16.msra.mxu0 %v2568_v6  ;;  %2675 = vmatpush1.bf16.msra.mxu1 %v2568_v6  ;;  %v3116_v6 = vpop.f32.mrb[7].mxu1 }
 0x118   :  { %v421_v8 = vpop.f32.mrb[23].mxu0  ;;  %2570 = vmatprep.subr.bf16.mxu0 %v3980_v35  ;;  %2660 = vmatprep.subr.bf16.mxu1 %v3980_v35 }
 0x119   :  { %v2571_v9 = vpack.c.bf16 %v2362_v7, %v421_v8  ;;  %v3120_v7 = vld [vmem:[#allocation3 + $0x90] sm:$0xff] }
 0x11a   :  { %4040 = vst [vmem:[#allocation17_spill] sm:$0xff] %v3120_v7  ;;  %v3122_v8 = vld [vmem:[#allocation3 + $0x190] sm:$0xff] }
 0x11b   :  { %v2365_v10 = vpop.f32.mrb[24].mxu0  ;;  %2572 = vmatpush1.bf16.msra.mxu0 %v2571_v9  ;;  %2676 = vmatpush1.bf16.msra.mxu1 %v2571_v9  ;;  %4041 = vst [vmem:[#allocation18_spill] sm:$0xff] %v3122_v8  ;;  %v3124_v9 = vld [vmem:[#allocation3 + $0xa8] sm:$0xff] }
 0x11c   :  { %v431_v11 = vpop.f32.mrb[25].mxu0  ;;  %2573 = vmatprep.subr.bf16.mxu0 %v3980_v35  ;;  %2661 = vmatprep.subr.bf16.mxu1 %v3980_v35  ;;  %4042 = vst [vmem:[#allocation19_spill] sm:$0xff] %v3124_v9 }
 0x11d   :  { %v2574_v12 = vpack.c.bf16 %v2365_v10, %v431_v11  ;;  %v3126_v10 = vld [vmem:[#allocation3 + $0x1a8] sm:$0xff]  ;;  %v3128_v11 = vpop.f32.mrb[8].mxu1 }
 0x11e   :  { %4043 = vst [vmem:[#allocation20_spill] sm:$0xff] %v3126_v10 }
 0x11f   :  { %v2368_v13 = vpop.f32.mrb[26].mxu0  ;;  %2575 = vmatpush1.bf16.msra.mxu0 %v2574_v12  ;;  %2677 = vmatpush1.bf16.msra.mxu1 %v2574_v12  ;;  %v3132_v12 = vpop.f32.mrb[9].mxu1 }
 0x120   :  { %v441_v14 = vpop.f32.mrb[27].mxu0  ;;  %2576 = vmatprep.subr.bf16.mxu0 %v3980_v35  ;;  %2662 = vmatprep.subr.bf16.mxu1 %v3980_v35 }
 0x121   :  { %v2577_v15 = vpack.c.bf16 %v2368_v13, %v441_v14  ;;  %v3136_v13 = vld [vmem:[#allocation3 + $0xa0] sm:$0xff] }
 0x122   :  { %4044 = vst [vmem:[#allocation21_spill] sm:$0xff] %v3136_v13  ;;  %v3138_v14 = vld [vmem:[#allocation3 + $0x1a0] sm:$0xff] }
 0x123   :  { %v2371_v16 = vpop.f32.mrb[28].mxu0  ;;  %2578 = vmatpush1.bf16.msra.mxu0 %v2577_v15  ;;  %2678 = vmatpush1.bf16.msra.mxu1 %v2577_v15  ;;  %4045 = vst [vmem:[#allocation22_spill] sm:$0xff] %v3138_v14  ;;  %v3140_v15 = vld [vmem:[#allocation3 + $0xb8] sm:$0xff] }
 0x124   :  { %v451_v17 = vpop.f32.mrb[29].mxu0  ;;  %2579 = vmatprep.subr.bf16.mxu0 %v3980_v35  ;;  %2663 = vmatprep.subr.bf16.mxu1 %v3980_v35  ;;  %4046 = vst [vmem:[#allocation23_spill] sm:$0xff] %v3140_v15 }
 0x125   :  { %v2580_v18 = vpack.c.bf16 %v2371_v16, %v451_v17  ;;  %v3142_v16 = vld [vmem:[#allocation3 + $0x1b8] sm:$0xff]  ;;  %v3144_v17 = vpop.f32.mrb[10].mxu1 }
 0x126   :  { %4047 = vst [vmem:[#allocation24_spill] sm:$0xff] %v3142_v16 }
 0x127   :  { %v2374_v21 = vpop.f32.mrb[30].mxu0  ;;  %2581 = vmatpush1.bf16.msra.mxu0 %v2580_v18  ;;  %2679 = vmatpush1.bf16.msra.mxu1 %v2580_v18  ;;  %v3148_v18 = vpop.f32.mrb[11].mxu1 }
 0x128   :  { %v461_v22 = vpop.f32.mrb[31].mxu0  ;;  %2582 = vmatprep.subr.bf16.mxu0 %v3980_v35  ;;  %2664 = vmatprep.subr.bf16.mxu1 %v3980_v35 }
 0x129   :  { %v2583_v24 = vpack.c.bf16 %v2374_v21, %v461_v22  ;;  %v3156_v21 = vld [vmem:[#allocation3 + $0xc8] sm:$0xff] }
 0x12a   :  { %4050 = vst [vmem:[#allocation27_spill] sm:$0xff] %v3156_v21  ;;  %v3158_v22 = vld [vmem:[#allocation3 + $0x1c8] sm:$0xff] }
 0x12b   :  { %2584 = vmatpush1.bf16.msra.mxu0 %v2583_v24  ;;  %2680 = vmatpush1.bf16.msra.mxu1 %v2583_v24  ;;  %4051 = vst [vmem:[#allocation28_spill] sm:$0xff] %v3158_v22 }
 0x12c   :  { %2586 = vmatprep.subr.bf16.mxu1 %v2585_v23  ;;  %2601 = vmatprep.subr.bf16.mxu0 %v3980_v35 }
 0x12e   :  { %761 = vmatmul.mubr.f32.vlgmr.msra.gmra.mrb[32].mxu0 %v3025_v25  ;;  %841 = vmatmul.mubr.f32.vlgmr.msra.gmra.mrb[32].mxu1 %v115_v26  ;;  %v3168_v26 = vld [vmem:[#allocation3 + $0xc0] sm:$0xff] }
 0x12f   :  { %765 = vmatprep.mubr.f32.mxu0 %v3027_v27  ;;  %845 = vmatprep.mubr.f32.mxu1 %v118_v28  ;;  %4052 = vst [vmem:[#allocation29_spill] sm:$0xff] %v3168_v26  ;;  %v3170_v28 = vld [vmem:[#allocation3 + $0x1c0] sm:$0xff] }
 0x130   :  { %2588 = vmatpush3.bf16.msra.mxu1 %v2585_v23  ;;  %v3160_v23 = vpop.f32.mrb[12].mxu1  ;;  %4053 = vst [vmem:[#allocation30_spill] sm:$0xff] %v3170_v28 }
 0x131   :  { %v3164_v24 = vpop.f32.mrb[13].mxu1 }
 0x132   :  { %766 = vmatmul.mubr.f32.gmra.mrb[34].mxu0 %v3032_v29  ;;  %846 = vmatmul.mubr.f32.gmra.mrb[34].mxu1 %v117_v30  ;;  %v3172_v30 = vld [vmem:[#allocation3 + $0xd8] sm:$0xff] }
 0x133   :  { %770 = vmatprep.mubr.f32.mxu0 %v3034_v31  ;;  %850 = vmatprep.mubr.f32.mxu1 %v120_v32  ;;  %4054 = vst [vmem:[#allocation31_spill] sm:$0xff] %v3172_v30  ;;  %v3174_v32 = vld [vmem:[#allocation3 + $0x1d8] sm:$0xff] }
 0x134   :  { %4055 = vst [vmem:[#allocation32_spill] sm:$0xff] %v3174_v32 }
 0x136   :  { %771 = vmatmul.mubr.f32.gmra.mrb[36].mxu0 %v3038_v33  ;;  %851 = vmatmul.mubr.f32.gmra.mrb[36].mxu1 %v119_v34  ;;  %v3176_v34 = vpop.f32.mrb[14].mxu1 }
 0x137   :  { %775 = vmatprep.mubr.f32.mxu0 %v3040_v37  ;;  %855 = vmatprep.mubr.f32.mxu1 %v122_v38  ;;  %v3180_v38 = vpop.f32.mrb[15].mxu1 }
 0x138   :  { %v2403_v35 = vpop.f32.mrb[16].mxu1 }
 0x13a   :  { %776 = vmatmul.mubr.f32.gmra.mrb[38].mxu0 %v3044_v39  ;;  %856 = vmatmul.mubr.f32.gmra.mrb[38].mxu1 %v121_v40  ;;  %v3184_v40 = vld [vmem:[#allocation3 + $0xd0] sm:$0xff] }
 0x13b   :  { %780 = vmatprep.mubr.f32.mxu0 %v3046_v41  ;;  %860 = vmatprep.mubr.f32.mxu1 %v124_v42  ;;  %4056 = vst [vmem:[#allocation33_spill] sm:$0xff] %v3184_v40  ;;  %v3186_v42 = vld [vmem:[#allocation3 + $0x1d0] sm:$0xff] }
 0x13c   :  { %4057 = vst [vmem:[#allocation34_spill] sm:$0xff] %v3186_v42 }
 0x13e   :  { %781 = vmatmul.mubr.f32.gmra.mrb[40].mxu0 %v3050_v43  ;;  %861 = vmatmul.mubr.f32.gmra.mrb[40].mxu1 %v123_v44  ;;  %v3188_v44 = vld [vmem:[#allocation3 + $0xe8] sm:$0xff] }
 0x13f   :  { %785 = vmatprep.mubr.f32.mxu0 %v3052_v45  ;;  %865 = vmatprep.mubr.f32.mxu1 %v126_v46  ;;  %4058 = vst [vmem:[#allocation35_spill] sm:$0xff] %v3188_v44  ;;  %v3190_v46 = vld [vmem:[#allocation3 + $0x1e8] sm:$0xff] }
 0x140   :  { %4059 = vst [vmem:[#allocation36_spill] sm:$0xff] %v3190_v46 }
 0x142   :  { %786 = vmatmul.mubr.f32.gmra.mrb[42].mxu0 %v3056_v47  ;;  %866 = vmatmul.mubr.f32.gmra.mrb[42].mxu1 %v3058_v48 }
 0x143   :  { %790 = vmatprep.mubr.f32.mxu0 %v3060_v49  ;;  %870 = vmatprep.mubr.f32.mxu1 %v3062_v50 }
 0x146   :  { %791 = vmatmul.mubr.f32.gmra.mrb[44].mxu0 %v3072_v53  ;;  %871 = vmatmul.mubr.f32.gmra.mrb[44].mxu1 %v3074_v54 }
 0x147   :  { %795 = vmatprep.mubr.f32.mxu0 %v3076_v55  ;;  %875 = vmatprep.mubr.f32.mxu1 %v3078_v56 }
 0x14a   :  { %796 = vmatmul.mubr.f32.gmra.mrb[46].mxu0 %v3088_v59  ;;  %876 = vmatmul.mubr.f32.gmra.mrb[46].mxu1 %v3090_v60 }
 0x14b   :  { %800 = vmatprep.mubr.f32.mxu0 %v3092_v61  ;;  %880 = vmatprep.mubr.f32.mxu1 %v3094_v62 }
 0x14e   :  { %801 = vmatmul.mubr.f32.gmra.mrb[48].mxu0 %v3104_v1  ;;  %881 = vmatmul.mubr.f32.gmra.mrb[48].mxu1 %v3106_v2 }
 0x14f   :  { %805 = vmatprep.mubr.f32.mxu0 %v3108_v3  ;;  %885 = vmatprep.mubr.f32.mxu1 %v3110_v4 }
 0x152   :  { %806 = vmatmul.mubr.f32.gmra.mrb[50].mxu0 %v3120_v7  ;;  %886 = vmatmul.mubr.f32.gmra.mrb[50].mxu1 %v3122_v8 }
 0x153   :  { %810 = vmatprep.mubr.f32.mxu0 %v3124_v9  ;;  %890 = vmatprep.mubr.f32.mxu1 %v3126_v10  ;;  %v3212_v10 = vld [vmem:[#allocation3 + $0x1f0] sm:$0xff] }
 0x154   :  { %4065 = vst [vmem:[#allocation42_spill] sm:$0xff] %v3212_v10 }
 0x156   :  { %811 = vmatmul.mubr.f32.gmra.mrb[52].mxu0 %v3136_v13  ;;  %891 = vmatmul.mubr.f32.gmra.mrb[52].mxu1 %v3138_v14 }
 0x157   :  { %815 = vmatprep.mubr.f32.mxu0 %v3140_v15  ;;  %895 = vmatprep.mubr.f32.mxu1 %v3142_v16  ;;  %v3202_v16 = vld [vmem:[#allocation3 + $0x1f8] sm:$0xff] }
 0x158   :  { %4063 = vst [vmem:[#allocation40_spill] sm:$0xff] %v3202_v16 }
 0x15a   :  { %816 = vmatmul.mubr.f32.gmra.mrb[54].mxu0 %v3152_v19  ;;  %896 = vmatmul.mubr.f32.gmra.mrb[54].mxu1 %v3154_v20  ;;  %v3200_v20 = vld [vmem:[#allocation3 + $0xf8] sm:$0xff] }
 0x15b   :  { %820 = vmatprep.mubr.f32.mxu0 %v3156_v21  ;;  %900 = vmatprep.mubr.f32.mxu1 %v3158_v22  ;;  %v3196_v22 = vld [vmem:[#allocation3 + $0xe0] sm:$0xff]  ;;  %4062 = vst [vmem:[#allocation39_spill] sm:$0xff] %v3200_v20 }
 0x15c   :  { %4060 = vst [vmem:[#allocation37_spill] sm:$0xff] %v3196_v22 }
 0x15e   :  { %821 = vmatmul.mubr.f32.gmra.mrb[56].mxu0 %v3168_v26  ;;  %901 = vmatmul.mubr.f32.gmra.mrb[56].mxu1 %v3170_v28  ;;  %v617_v28 = vpop.f32.mrb[17].mxu1  ;;  %v3256_v26 = vld [vmem:[%s3973_s4] ss:$0 sm:$0xff] }
 0x15f   :  { %825 = vmatprep.mubr.f32.mxu0 %v3172_v30  ;;  %905 = vmatprep.mubr.f32.mxu1 %v3174_v32  ;;  %v3198_v32 = vld [vmem:[#allocation3 + $0x1e0] sm:$0xff]  ;;  %v3204_v14 = vpop.f32.mrb[18].mxu1 }
 0x160   :  { %4061 = vst [vmem:[#allocation38_spill] sm:$0xff] %v3198_v32 }
 0x162   :  { %826 = vmatmul.mubr.f32.gmra.mrb[58].mxu0 %v3184_v40  ;;  %906 = vmatmul.mubr.f32.gmra.mrb[58].mxu1 %v3186_v42  ;;  %v627_v42 = vpop.f32.mrb[19].mxu1 }
 0x163   :  { %830 = vmatprep.mubr.f32.mxu0 %v3188_v44  ;;  %910 = vmatprep.mubr.f32.mxu1 %v3190_v46  ;;  %v3210_v46 = vld [vmem:[#allocation3 + $0xf0] sm:$0xff]  ;;  %v3214_v8 = vpop.f32.mrb[20].mxu1  ;;  %v1319_v44 = vld [vmem:[%s3975_s6 + $0x8] sm:$0xff] }
 0x164   :  { %4064 = vst [vmem:[#allocation41_spill] sm:$0xff] %v3210_v46  ;;  %v3218_v4 = vpop.f32.mrb[21].mxu1 }
 0x166   :  { %831 = vmatmul.mubr.f32.gmra.mrb[60].mxu0 %v3196_v22  ;;  %911 = vmatmul.mubr.f32.gmra.mrb[60].mxu1 %v3198_v32  ;;  %v3221_v32 = vpop.f32.mrb[22].mxu1  ;;  %v1318_v22 = vld [vmem:[%s3975_s6] sm:$0xff] }
 0x167   :  { %835 = vmatprep.mubr.f32.mxu0 %v3200_v20  ;;  %915 = vmatprep.mubr.f32.mxu1 %v3202_v16  ;;  %v3223_v2 = vpop.f32.mrb[23].mxu1  ;;  %v2593_v40 = vpack.c.bf16 %v1319_v44, %v1318_v22 }
 0x168   :  { %v3225_v62 = vpop.f32.mrb[24].mxu1 }
 0x169   :  { %v3227_v16 = vpop.f32.mrb[25].mxu1 }
 0x16a   :  { %836 = vmatmul.mubr.f32.gmra.mrb[62].mxu0 %v3210_v46  ;;  %916 = vmatmul.mubr.f32.gmra.mrb[62].mxu1 %v3212_v10  ;;  %v3229_v60 = vpop.f32.mrb[26].mxu1  ;;  %v995_v46 = vld [vmem:[%s3974_s5 + $0x18] sm:$0xff] }
 0x16b   :  { %1611 = vmatprep.mubr.f32.mxu0 %v2986_v36  ;;  %v3231_v56 = vpop.f32.mrb[27].mxu1  ;;  %v994_v36 = vld [vmem:[%s3974_s5 + $0x10] sm:$0xff] }
 0x16c   :  { %v3233_v54 = vpop.f32.mrb[28].mxu1  ;;  %v2589_v20 = vpack.c.bf16 %v995_v46, %v994_v36 }
 0x16d   :  { %v3235_v50 = vpop.f32.mrb[29].mxu1 }
 0x16e   :  { %v3237_v10 = vpop.f32.mrb[30].mxu1  ;;  %2590 = vmatprep.subr.bf16.mxu1 %v2589_v20 }
 0x16f   :  { %v3239_v48 = vpop.f32.mrb[31].mxu1  ;;  %2592 = vmatpush3.bf16.msra.mxu1 %v2589_v20 }
 0x170   :  { %2594 = vmatprep.subr.bf16.mxu1 %v2593_v40 }
 0x201   :  { %v762_v30 = vpop.f32.mrb[32].mxu0  ;;  %v842_v21 = vpop.f32.mrb[32].mxu1 }
 0x202   :  { %v763_v46 = vadd.f32 %v762_v30, %v3068_v52  ;;  %v3259_v20 = vadd.f32 %v842_v21, %v617_v28  ;;  %v764_v36 = vpop.f32.mrb[33].mxu0  ;;  %v844_v19 = vpop.f32.mrb[33].mxu1  ;;  %v1320_v52 = vld [vmem:[%s3975_s6 + $0x10] sm:$0xff] }
 0x203   :  { %v1321_v19 = vld [vmem:[%s3975_s6 + $0x18] sm:$0xff] }
 0x204   :  { %v3262_v15 = vadd.f32 %v3256_v26, %v763_v46  ;;  %v2597_v46 = vpack.c.bf16 %v1321_v19, %v1320_v52 }
 0x205   :  { %v767_v13 = vpop.f32.mrb[34].mxu0  ;;  %v847_v9 = vpop.f32.mrb[34].mxu1 }
 0x206   :  { %v4018_v22 = vmax.f32 %v3262_v15, 0.0  ;;  %v768_v44 = vadd.f32 %v3064_v51, %v767_v13  ;;  %v848_v7 = vadd.f32 %v2403_v35, %v847_v9  ;;  %v769_v3 = vpop.f32.mrb[35].mxu0  ;;  %v849_v1 = vpop.f32.mrb[35].mxu1 }
 0x208   :  { %v3273_v21 = vadd.f32 %v3256_v26, %v768_v44  ;;  %v3276_v28 = vadd.f32 %v3256_v26, %v848_v7  ;;  %2433 = vmatprep.mubr.msk.f32.mxu1 %vm996_vm1, %v4018_v22 }
 0x209   :  { %v772_v35 = vpop.f32.mrb[36].mxu0  ;;  %v852_v51 = vpop.f32.mrb[36].mxu1 }
 0x20a   :  { %v961_v1 = vmax.f32 %v3273_v21, 0.0  ;;  %v773_v3 = vadd.f32 %v772_v35, %v3084_v58  ;;  %v853_v9 = vadd.f32 %v852_v51, %v627_v42  ;;  %v774_v13 = vpop.f32.mrb[37].mxu0  ;;  %v854_v30 = vpop.f32.mrb[37].mxu1 }
 0x20c   :  { %v3284_v36 = vadd.f32 %v3256_v26, %v773_v3  ;;  %v3287_v7 = vadd.f32 %v3256_v26, %v853_v9  ;;  %2434 = vmatmul.mubr.msk.f32.vlgmr.msra.gmra.mrb[64].mxu1 %vm996_vm1, %v961_v1 }
 0x20d   :  { %v777_v44 = vpop.f32.mrb[38].mxu0  ;;  %v857_v22 = vpop.f32.mrb[38].mxu1  ;;  %2596 = vmatpush3.bf16.msra.mxu1 %v2593_v40 }
 0x20e   :  { %v962_v61 = vmax.f32 %v3284_v36, 0.0  ;;  %v778_v58 = vadd.f32 %v3080_v57, %v777_v44  ;;  %v858_v42 = vadd.f32 %v3204_v14, %v857_v22  ;;  %v779_v52 = vpop.f32.mrb[39].mxu0  ;;  %v859_v19 = vpop.f32.mrb[39].mxu1  ;;  %2598 = vmatprep.subr.bf16.mxu1 %v2597_v46 }
 0x210   :  { %v3296_v35 = vadd.f32 %v3256_v26, %v778_v58  ;;  %v3299_v51 = vadd.f32 %v3256_v26, %v858_v42  ;;  %2436 = vmatprep.mubr.msk.f32.mxu1 %vm996_vm1, %v962_v61 }
 0x211   :  { %v782_v40 = vpop.f32.mrb[40].mxu0  ;;  %v862_v3 = vpop.f32.mrb[40].mxu1  ;;  %2600 = vmatpush3.bf16.msra.mxu1 %v2597_v46 }
 0x212   :  { %v963_v57 = vmax.f32 %v3296_v35, 0.0  ;;  %v783_v14 = vadd.f32 %v782_v40, %v3100_v0  ;;  %v863_v22 = vadd.f32 %v862_v3, %v3218_v4  ;;  %v784_v9 = vpop.f32.mrb[41].mxu0  ;;  %v864_v13 = vpop.f32.mrb[41].mxu1 }
 0x214   :  { %v3308_v30 = vadd.f32 %v3256_v26, %v783_v14  ;;  %v3311_v44 = vadd.f32 %v3256_v26, %v863_v22  ;;  %2437 = vmatmul.mubr.msk.f32.gmra.mrb[66].mxu1 %vm996_vm1, %v963_v57 }
 0x215   :  { %v787_v58 = vpop.f32.mrb[42].mxu0  ;;  %v867_v46 = vpop.f32.mrb[42].mxu1 }
 0x216   :  { %v964_v42 = vmax.f32 %v3308_v30, 0.0  ;;  %v788_v0 = vadd.f32 %v3096_v63, %v787_v58  ;;  %v868_v4 = vadd.f32 %v3214_v8, %v867_v46  ;;  %v789_v52 = vpop.f32.mrb[43].mxu0  ;;  %v869_v19 = vpop.f32.mrb[43].mxu1 }
 0x218   :  { %v3320_v40 = vadd.f32 %v3256_v26, %v788_v0  ;;  %v3323_v3 = vadd.f32 %v3256_v26, %v868_v4  ;;  %2439 = vmatprep.mubr.msk.f32.mxu1 %vm996_vm1, %v964_v42 }
 0x219   :  { %v792_v14 = vpop.f32.mrb[44].mxu0  ;;  %v872_v22 = vpop.f32.mrb[44].mxu1 }
 0x21a   :  { %v4020_v9 = vmax.f32 %v3320_v40, 0.0  ;;  %v793_v63 = vadd.f32 %v792_v14, %v3116_v6  ;;  %v873_v8 = vadd.f32 %v872_v22, %v3223_v2  ;;  %v794_v13 = vpop.f32.mrb[45].mxu0  ;;  %v874_v58 = vpop.f32.mrb[45].mxu1 }
 0x21c   :  { %v3332_v46 = vadd.f32 %v3256_v26, %v793_v63  ;;  %v3335_v0 = vadd.f32 %v3256_v26, %v873_v8  ;;  %2440 = vmatmul.mubr.msk.f32.gmra.mrb[68].mxu1 %vm996_vm1, %v4020_v9 }
 0x21d   :  { %v797_v4 = vpop.f32.mrb[46].mxu0  ;;  %v877_v52 = vpop.f32.mrb[46].mxu1 }
 0x21e   :  { %v4021_v19 = vmax.f32 %v3332_v46, 0.0  ;;  %v798_v6 = vadd.f32 %v3112_v5, %v797_v4  ;;  %v878_v2 = vadd.f32 %v3221_v32, %v877_v52  ;;  %v799_v14 = vpop.f32.mrb[47].mxu0  ;;  %v879_v22 = vpop.f32.mrb[47].mxu1  ;;  %v4068_v21 = vmax.f32 %v3332_v46, 0.0 }
 0x220   :  { %v3344_v63 = vadd.f32 %v3256_v26, %v798_v6  ;;  %v3347_v8 = vadd.f32 %v3256_v26, %v878_v2  ;;  %2442 = vmatprep.mubr.msk.f32.mxu1 %vm996_vm1, %v4021_v19 }
 0x221   :  { %v802_v13 = vpop.f32.mrb[48].mxu0  ;;  %v882_v58 = vpop.f32.mrb[48].mxu1 }
 0x222   :  { %v4022_v9 = vmax.f32 %v3344_v63, 0.0  ;;  %v803_v5 = vadd.f32 %v802_v13, %v3132_v12  ;;  %v883_v32 = vadd.f32 %v882_v58, %v3227_v16  ;;  %v804_v4 = vpop.f32.mrb[49].mxu0  ;;  %v884_v52 = vpop.f32.mrb[49].mxu1 }
 0x224   :  { %v3356_v6 = vadd.f32 %v3256_v26, %v803_v5  ;;  %v3359_v2 = vadd.f32 %v3256_v26, %v883_v32  ;;  %2443 = vmatmul.mubr.msk.f32.gmra.mrb[70].mxu1 %vm996_vm1, %v4022_v9 }
 0x225   :  { %v807_v14 = vpop.f32.mrb[50].mxu0  ;;  %v887_v22 = vpop.f32.mrb[50].mxu1 }
 0x226   :  { %v4023_v19 = vmax.f32 %v3356_v6, 0.0  ;;  %v808_v12 = vadd.f32 %v3128_v11, %v807_v14  ;;  %v888_v16 = vadd.f32 %v3225_v62, %v887_v22  ;;  %v809_v13 = vpop.f32.mrb[51].mxu0  ;;  %v889_v58 = vpop.f32.mrb[51].mxu1 }
 0x228   :  { %v3368_v5 = vadd.f32 %v3256_v26, %v808_v12  ;;  %v3371_v32 = vadd.f32 %v3256_v26, %v888_v16  ;;  %2445 = vmatprep.mubr.msk.f32.mxu1 %vm996_vm1, %v4023_v19 }
 0x229   :  { %v812_v4 = vpop.f32.mrb[52].mxu0  ;;  %v892_v52 = vpop.f32.mrb[52].mxu1 }
 0x22a   :  { %v4024_v9 = vmax.f32 %v3368_v5, 0.0  ;;  %v813_v11 = vadd.f32 %v812_v4, %v3148_v18  ;;  %v893_v62 = vadd.f32 %v892_v52, %v3231_v56  ;;  %v814_v14 = vpop.f32.mrb[53].mxu0  ;;  %v894_v22 = vpop.f32.mrb[53].mxu1  ;;  %v4071_v36 = vmax.f32 %v3368_v5, 0.0 }
 0x22c   :  { %v3380_v12 = vadd.f32 %v3256_v26, %v813_v11  ;;  %v3383_v16 = vadd.f32 %v3256_v26, %v893_v62  ;;  %2446 = vmatmul.mubr.msk.f32.gmra.mrb[72].mxu1 %vm996_vm1, %v4024_v9 }
 0x22d   :  { %v817_v13 = vpop.f32.mrb[54].mxu0  ;;  %v897_v58 = vpop.f32.mrb[54].mxu1 }
 0x22e   :  { %v4025_v19 = vmax.f32 %v3380_v12, 0.0  ;;  %v818_v18 = vadd.f32 %v3144_v17, %v817_v13  ;;  %v898_v56 = vadd.f32 %v3229_v60, %v897_v58  ;;  %v819_v4 = vpop.f32.mrb[55].mxu0  ;;  %v899_v52 = vpop.f32.mrb[55].mxu1  ;;  %v4072_v35 = vmax.f32 %v3380_v12, 0.0 }
 0x230   :  { %v3392_v11 = vadd.f32 %v3256_v26, %v818_v18  ;;  %v3395_v62 = vadd.f32 %v3256_v26, %v898_v56  ;;  %2448 = vmatprep.mubr.msk.f32.mxu1 %vm996_vm1, %v4025_v19 }
 0x231   :  { %v822_v14 = vpop.f32.mrb[56].mxu0  ;;  %v902_v22 = vpop.f32.mrb[56].mxu1 }
 0x232   :  { %v4026_v9 = vmax.f32 %v3392_v11, 0.0  ;;  %v823_v17 = vadd.f32 %v822_v14, %v3164_v24  ;;  %v903_v60 = vadd.f32 %v902_v22, %v3235_v50  ;;  %v824_v13 = vpop.f32.mrb[57].mxu0  ;;  %v904_v58 = vpop.f32.mrb[57].mxu1 }
 0x234   :  { %v3404_v18 = vadd.f32 %v3256_v26, %v823_v17  ;;  %v3407_v56 = vadd.f32 %v3256_v26, %v903_v60  ;;  %2449 = vmatmul.mubr.msk.f32.gmra.mrb[74].mxu1 %vm996_vm1, %v4026_v9 }
 0x235   :  { %v827_v4 = vpop.f32.mrb[58].mxu0  ;;  %v907_v52 = vpop.f32.mrb[58].mxu1 }
 0x236   :  { %v4027_v19 = vmax.f32 %v3404_v18, 0.0  ;;  %v828_v24 = vadd.f32 %v3160_v23, %v827_v4  ;;  %v908_v50 = vadd.f32 %v3233_v54, %v907_v52  ;;  %v829_v14 = vpop.f32.mrb[59].mxu0  ;;  %v909_v22 = vpop.f32.mrb[59].mxu1  ;;  %v4074_v30 = vmax.f32 %v3404_v18, 0.0 }
 0x238   :  { %v3416_v17 = vadd.f32 %v3256_v26, %v828_v24  ;;  %v3419_v60 = vadd.f32 %v3256_v26, %v908_v50  ;;  %2451 = vmatprep.mubr.msk.f32.mxu1 %vm996_vm1, %v4027_v19 }
 0x239   :  { %v832_v13 = vpop.f32.mrb[60].mxu0  ;;  %v912_v58 = vpop.f32.mrb[60].mxu1 }
 0x23a   :  { %v4028_v9 = vmax.f32 %v3416_v17, 0.0  ;;  %v833_v23 = vadd.f32 %v832_v13, %v3180_v38  ;;  %v913_v54 = vadd.f32 %v912_v58, %v3239_v48  ;;  %v834_v4 = vpop.f32.mrb[61].mxu0  ;;  %v914_v52 = vpop.f32.mrb[61].mxu1 }
 0x23c   :  { %v3428_v24 = vadd.f32 %v3256_v26, %v833_v23  ;;  %v3431_v50 = vadd.f32 %v3256_v26, %v913_v54  ;;  %2452 = vmatmul.mubr.msk.f32.gmra.mrb[76].mxu1 %vm996_vm1, %v4028_v9  ;;  %v944_v23 = vadd.f32 %v3256_v26, %v3259_v20  ;;  %v979_v20 = vmax.f32 %v3299_v51, 0.0 }
 0x23d   :  { %v837_v14 = vpop.f32.mrb[62].mxu0  ;;  %v917_v22 = vpop.f32.mrb[62].mxu1  ;;  %v985_v51 = vmax.f32 %v3371_v32, 0.0 }
 0x23e   :  { %v974_v19 = vmax.f32 %v3428_v24, 0.0  ;;  %v838_v38 = vadd.f32 %v3176_v34, %v837_v14  ;;  %v918_v48 = vadd.f32 %v3237_v10, %v917_v22  ;;  %v839_v13 = vpop.f32.mrb[63].mxu0  ;;  %v919_v58 = vpop.f32.mrb[63].mxu1  ;;  %v976_v9 = vmax.f32 %v944_v23, 0.0 }
 0x23f   :  { %v977_v10 = vmax.f32 %v3276_v28, 0.0  ;;  %v978_v34 = vmax.f32 %v3287_v7, 0.0  ;;  %v981_v24 = vmax.f32 %v3323_v3, 0.0  ;;  %v982_v14 = vmax.f32 %v3335_v0, 0.0 }
 0x240   :  { %v943_v54 = vadd.f32 %v3256_v26, %v838_v38  ;;  %v3443_v4 = vadd.f32 %v3256_v26, %v918_v48  ;;  %2454 = vmatprep.mubr.msk.f32.mxu1 %vm996_vm1, %v974_v19  ;;  %v980_v26 = vmax.f32 %v3311_v44, 0.0  ;;  %v983_v28 = vmax.f32 %v3347_v8, 0.0 }
 0x241   :  { %v984_v7 = vmax.f32 %v3359_v2, 0.0  ;;  %v986_v44 = vmax.f32 %v3383_v16, 0.0  ;;  %v987_v3 = vmax.f32 %v3395_v62, 0.0  ;;  %v988_v0 = vmax.f32 %v3407_v56, 0.0 }
 0x242   :  { %v975_v52 = vmax.f32 %v943_v54, 0.0  ;;  %v989_v8 = vmax.f32 %v3419_v60, 0.0  ;;  %v990_v2 = vmax.f32 %v3431_v50, 0.0  ;;  %v991_v32 = vmax.f32 %v3443_v4, 0.0 }
 0x243   :  { %v4066_v16 = vmax.f32 %v3262_v15, 0.0  ;;  %v4067_v15 = vmax.f32 %v3320_v40, 0.0 }
 0x244   :  { %2455 = vmatmul.mubr.msk.f32.gmra.mrb[78].mxu1 %vm996_vm1, %v975_v52 }
 0x245   :  { %2457 = vmatprep.mubr.msk.f32.mxu1 %vm996_vm1, %v976_v9 }
 0x248   :  { %2458 = vmatmul.mubr.msk.f32.gmra.mrb[80].mxu1 %vm996_vm1, %v977_v10 }
 0x249   :  { %2460 = vmatprep.mubr.msk.f32.mxu1 %vm996_vm1, %v978_v34 }
 0x24c   :  { %2461 = vmatmul.mubr.msk.f32.gmra.mrb[82].mxu1 %vm996_vm1, %v979_v20 }
 0x24d   :  { %2463 = vmatprep.mubr.msk.f32.mxu1 %vm996_vm1, %v980_v26 }
 0x250   :  { %2464 = vmatmul.mubr.msk.f32.gmra.mrb[84].mxu1 %vm996_vm1, %v981_v24 }
 0x251   :  { %2466 = vmatprep.mubr.msk.f32.mxu1 %vm996_vm1, %v982_v14 }
 0x254   :  { %2467 = vmatmul.mubr.msk.f32.gmra.mrb[86].mxu1 %vm996_vm1, %v983_v28 }
 0x255   :  { %2469 = vmatprep.mubr.msk.f32.mxu1 %vm996_vm1, %v984_v7 }
 0x258   :  { %2470 = vmatmul.mubr.msk.f32.gmra.mrb[88].mxu1 %vm996_vm1, %v985_v51 }
 0x259   :  { %2472 = vmatprep.mubr.msk.f32.mxu1 %vm996_vm1, %v986_v44 }
 0x25c   :  { %2473 = vmatmul.mubr.msk.f32.gmra.mrb[90].mxu1 %vm996_vm1, %v987_v3 }
 0x25d   :  { %2475 = vmatprep.mubr.msk.f32.mxu1 %vm996_vm1, %v988_v0 }
 0x260   :  { %2476 = vmatmul.mubr.msk.f32.gmra.mrb[92].mxu1 %vm996_vm1, %v989_v8 }
 0x261   :  { %2478 = vmatprep.mubr.msk.f32.mxu1 %vm996_vm1, %v990_v2 }
 0x264   :  { %2479 = vmatmul.mubr.msk.f32.gmra.mrb[94].mxu1 %vm996_vm1, %v991_v32 }
 0x265   :  { %2489 = vmatprep.mubr.msk.f32.mxu1 %vm996_vm1, %v4066_v16 }
 0x268   :  { %2490 = vmatmul.mubr.msk.f32.vlgmr.msra.gmra.mrb[96].mxu1 %vm996_vm1, %v961_v1  ;;  %v4069_v1 = vmax.f32 %v3344_v63, 0.0 }
 0x269   :  { %2492 = vmatprep.mubr.msk.f32.mxu1 %vm996_vm1, %v962_v61  ;;  %v4070_v61 = vmax.f32 %v3356_v6, 0.0 }
 0x26c   :  { %2493 = vmatmul.mubr.msk.f32.gmra.mrb[98].mxu1 %vm996_vm1, %v963_v57  ;;  %v4073_v57 = vmax.f32 %v3392_v11, 0.0 }
 0x26d   :  { %2495 = vmatprep.mubr.msk.f32.mxu1 %vm996_vm1, %v964_v42  ;;  %v4075_v42 = vmax.f32 %v3416_v17, 0.0 }
 0x270   :  { %2496 = vmatmul.mubr.msk.f32.gmra.mrb[100].mxu1 %vm996_vm1, %v4067_v15 }
 0x271   :  { %2498 = vmatprep.mubr.msk.f32.mxu1 %vm996_vm1, %v4068_v21 }
 0x274   :  { %2499 = vmatmul.mubr.msk.f32.gmra.mrb[102].mxu1 %vm996_vm1, %v4069_v1 }
 0x275   :  { %2501 = vmatprep.mubr.msk.f32.mxu1 %vm996_vm1, %v4070_v61 }
 0x278   :  { %2502 = vmatmul.mubr.msk.f32.gmra.mrb[104].mxu1 %vm996_vm1, %v4071_v36 }
 0x279   :  { %2504 = vmatprep.mubr.msk.f32.mxu1 %vm996_vm1, %v4072_v35 }
 0x27c   :  { %2505 = vmatmul.mubr.msk.f32.gmra.mrb[106].mxu1 %vm996_vm1, %v4073_v57 }
 0x27d   :  { %2507 = vmatprep.mubr.msk.f32.mxu1 %vm996_vm1, %v4074_v30 }
 0x280   :  { %2508 = vmatmul.mubr.msk.f32.gmra.mrb[108].mxu1 %vm996_vm1, %v4075_v42 }
 0x281   :  { %2510 = vmatprep.mubr.msk.f32.mxu1 %vm996_vm1, %v974_v19  ;;  %v4076_v19 = vmov 0.0|0.0  }
 0x284   :  { %2511 = vmatmul.mubr.msk.f32.gmra.mrb[110].mxu1 %vm996_vm1, %v975_v52 }
 0x285   :  { %2513 = vmatprep.mubr.msk.f32.mxu1 %vm996_vm1, %v976_v9 }
 0x288   :  { %2514 = vmatmul.mubr.msk.f32.gmra.mrb[112].mxu1 %vm996_vm1, %v977_v10 }
 0x289   :  { %2516 = vmatprep.mubr.msk.f32.mxu1 %vm996_vm1, %v978_v34 }
 0x28c   :  { %2517 = vmatmul.mubr.msk.f32.gmra.mrb[114].mxu1 %vm996_vm1, %v979_v20 }
 0x28d   :  { %2519 = vmatprep.mubr.msk.f32.mxu1 %vm996_vm1, %v980_v26 }
 0x290   :  { %2520 = vmatmul.mubr.msk.f32.gmra.mrb[116].mxu1 %vm996_vm1, %v981_v24 }
 0x291   :  { %2522 = vmatprep.mubr.msk.f32.mxu1 %vm996_vm1, %v982_v14 }
 0x294   :  { %2523 = vmatmul.mubr.msk.f32.gmra.mrb[118].mxu1 %vm996_vm1, %v983_v28 }
 0x295   :  { %2525 = vmatprep.mubr.msk.f32.mxu1 %vm996_vm1, %v984_v7 }
 0x298   :  { %2526 = vmatmul.mubr.msk.f32.gmra.mrb[120].mxu1 %vm996_vm1, %v985_v51 }
 0x299   :  { %2528 = vmatprep.mubr.msk.f32.mxu1 %vm996_vm1, %v986_v44 }
 0x29c   :  { %2529 = vmatmul.mubr.msk.f32.gmra.mrb[122].mxu1 %vm996_vm1, %v987_v3 }
 0x29d   :  { %2531 = vmatprep.mubr.msk.f32.mxu1 %vm996_vm1, %v988_v0 }
 0x2a0   :  { %2532 = vmatmul.mubr.msk.f32.gmra.mrb[124].mxu1 %vm996_vm1, %v989_v8 }
 0x2a1   :  { %2534 = vmatprep.mubr.msk.f32.mxu1 %vm996_vm1, %v990_v2 }
 0x2a4   :  { %2535 = vmatmul.mubr.msk.f32.gmra.mrb[126].mxu1 %vm996_vm1, %v991_v32 }
 0x2df   :  { %v2435_v40 = vpop.f32.mrb[64].mxu1 }
 0x2e0   :  { %v1159_v9 = vpop.f32.mrb[65].mxu1 }
 0x2e1   :  { %v2602_v46 = vpack.c.bf16 %v2435_v40, %v1159_v9 }
 0x2e3   :  { %2603 = vmatpush1.bf16.msra.mxu0 %v2602_v46 }
 0x2e4   :  { %2604 = vmatprep.subr.bf16.mxu0 %v4076_v19 }
 0x2e7   :  { %v2438_v63 = vpop.f32.mrb[66].mxu1 }
 0x2e8   :  { %v1169_v6 = vpop.f32.mrb[67].mxu1 }
 0x2e9   :  { %v2605_v5 = vpack.c.bf16 %v2438_v63, %v1169_v6 }
 0x2eb   :  { %2606 = vmatpush1.bf16.msra.mxu0 %v2605_v5 }
 0x2ec   :  { %2607 = vmatprep.subr.bf16.mxu0 %v4076_v19 }
 0x2ef   :  { %v2441_v12 = vpop.f32.mrb[68].mxu1 }
 0x2f0   :  { %v1179_v11 = vpop.f32.mrb[69].mxu1 }
 0x2f1   :  { %v2608_v62 = vpack.c.bf16 %v2441_v12, %v1179_v11  ;;  %v4077_v12 = vld [vmem:[#allocation11_spill] sm:$0xff]  ;;  %v4078_v11 = vld [vmem:[#allocation13_spill] sm:$0xff] }
 0x2f3   :  { %2609 = vmatpush1.bf16.msra.mxu0 %v2608_v62  ;;  %v4079_v62 = vld [vmem:[#allocation15_spill] sm:$0xff] }
 0x2f4   :  { %2610 = vmatprep.subr.bf16.mxu0 %v4076_v19 }
 0x2f7   :  { %v2444_v18 = vpop.f32.mrb[70].mxu1 }
 0x2f8   :  { %v1189_v56 = vpop.f32.mrb[71].mxu1 }
 0x2f9   :  { %v2611_v17 = vpack.c.bf16 %v2444_v18, %v1189_v56  ;;  %v4080_v18 = vld [vmem:[#allocation17_spill] sm:$0xff]  ;;  %v4081_v56 = vld [vmem:[#allocation19_spill] sm:$0xff] }
 0x2fb   :  { %2612 = vmatpush1.bf16.msra.mxu0 %v2611_v17  ;;  %v4082_v17 = vld [vmem:[#allocation21_spill] sm:$0xff] }
 0x2fc   :  { %2613 = vmatprep.subr.bf16.mxu0 %v4076_v19 }
 0x2ff   :  { %v2447_v60 = vpop.f32.mrb[72].mxu1 }
 0x300   :  { %v1199_v50 = vpop.f32.mrb[73].mxu1 }
 0x301   :  { %v2614_v22 = vpack.c.bf16 %v2447_v60, %v1199_v50  ;;  %v4083_v50 = vld [vmem:[#allocation23_spill] sm:$0xff] }
 0x303   :  { %2615 = vmatpush1.bf16.msra.mxu0 %v2614_v22 }
 0x304   :  { %2616 = vmatprep.subr.bf16.mxu0 %v4076_v19 }
 0x307   :  { %v2450_v38 = vpop.f32.mrb[74].mxu1 }
 0x308   :  { %v1209_v48 = vpop.f32.mrb[75].mxu1 }
 0x309   :  { %v2617_v13 = vpack.c.bf16 %v2450_v38, %v1209_v48  ;;  %v4084_v38 = vld [vmem:[#allocation25_spill] sm:$0xff] }
 0x30b   :  { %2618 = vmatpush1.bf16.msra.mxu0 %v2617_v13  ;;  %v4085_v13 = vld [vmem:[#allocation27_spill] sm:$0xff] }
 0x30c   :  { %2619 = vmatprep.subr.bf16.mxu0 %v4076_v19 }
 0x30f   :  { %v2453_v58 = vpop.f32.mrb[76].mxu1 }
 0x310   :  { %v1219_v23 = vpop.f32.mrb[77].mxu1 }
 0x311   :  { %v2620_v54 = vpack.c.bf16 %v2453_v58, %v1219_v23  ;;  %v4086_v23 = vld [vmem:[#allocation29_spill] sm:$0xff] }
 0x313   :  { %2621 = vmatpush1.bf16.msra.mxu0 %v2620_v54 }
 0x314   :  { %2622 = vmatprep.subr.bf16.mxu0 %v4076_v19 }
 0x317   :  { %v2456_v4 = vpop.f32.mrb[78].mxu1 }
 0x318   :  { %v1229_v52 = vpop.f32.mrb[79].mxu1 }
 0x319   :  { %v2623_v10 = vpack.c.bf16 %v2456_v4, %v1229_v52  ;;  %v4087_v4 = vld [vmem:[#allocation31_spill] sm:$0xff] }
 0x31b   :  { %v2459_v34 = vpop.f32.mrb[80].mxu1  ;;  %2624 = vmatpush1.bf16.msra.mxu0 %v2623_v10  ;;  %v4088_v10 = vld [vmem:[#allocation33_spill] sm:$0xff] }
 0x31c   :  { %v1239_v20 = vpop.f32.mrb[81].mxu1  ;;  %2625 = vmatprep.subr.bf16.mxu0 %v4076_v19 }
 0x31d   :  { %v2626_v26 = vpack.c.bf16 %v2459_v34, %v1239_v20  ;;  %v4089_v20 = vld [vmem:[#allocation35_spill] sm:$0xff] }
 0x31f   :  { %v2462_v24 = vpop.f32.mrb[82].mxu1  ;;  %2627 = vmatpush1.bf16.msra.mxu0 %v2626_v26 }
 0x320   :  { %v1249_v14 = vpop.f32.mrb[83].mxu1  ;;  %2628 = vmatprep.subr.bf16.mxu0 %v4076_v19 }
 0x321   :  { %v2629_v28 = vpack.c.bf16 %v2462_v24, %v1249_v14  ;;  %v4090_v24 = vld [vmem:[#allocation37_spill] sm:$0xff] }
 0x323   :  { %v2465_v7 = vpop.f32.mrb[84].mxu1  ;;  %2630 = vmatpush1.bf16.msra.mxu0 %v2629_v28  ;;  %v4091_v28 = vld [vmem:[#allocation39_spill] sm:$0xff] }
 0x324   :  { %v1259_v51 = vpop.f32.mrb[85].mxu1  ;;  %2631 = vmatprep.subr.bf16.mxu0 %v4076_v19 }
 0x325   :  { %v2632_v44 = vpack.c.bf16 %v2465_v7, %v1259_v51  ;;  %v4092_v51 = vld [vmem:[#allocation41_spill] sm:$0xff] }
 0x327   :  { %v2468_v3 = vpop.f32.mrb[86].mxu1  ;;  %2633 = vmatpush1.bf16.msra.mxu0 %v2632_v44  ;;  %v2685_v44 = vld [vmem:[#allocation3 + $0x108] sm:$0xff] }
 0x328   :  { %v1269_v0 = vpop.f32.mrb[87].mxu1  ;;  %2634 = vmatprep.subr.bf16.mxu0 %v4076_v19 }
 0x329   :  { %v2635_v8 = vpack.c.bf16 %v2468_v3, %v1269_v0  ;;  %v2686_v3 = vld [vmem:[#allocation3 + $0x100] sm:$0xff]  ;;  %v2687_v0 = vld [vmem:[#allocation3 + $0x118] sm:$0xff] }
 0x32b   :  { %v2471_v2 = vpop.f32.mrb[88].mxu1  ;;  %2636 = vmatpush1.bf16.msra.mxu0 %v2635_v8  ;;  %v2688_v8 = vld [vmem:[#allocation3 + $0x110] sm:$0xff] }
 0x32c   :  { %v1279_v32 = vpop.f32.mrb[89].mxu1  ;;  %2637 = vmatprep.subr.bf16.mxu0 %v4076_v19 }
 0x32d   :  { %v2638_v16 = vpack.c.bf16 %v2471_v2, %v1279_v32  ;;  %v2689_v2 = vld [vmem:[#allocation3 + $0x128] sm:$0xff]  ;;  %v2690_v32 = vld [vmem:[#allocation3 + $0x120] sm:$0xff] }
 0x32f   :  { %v2474_v15 = vpop.f32.mrb[90].mxu1  ;;  %2639 = vmatpush1.bf16.msra.mxu0 %v2638_v16  ;;  %v2691_v16 = vld [vmem:[#allocation3 + $0x138] sm:$0xff] }
 0x330   :  { %v1289_v21 = vpop.f32.mrb[91].mxu1  ;;  %2640 = vmatprep.subr.bf16.mxu0 %v4076_v19 }
 0x331   :  { %v2641_v1 = vpack.c.bf16 %v2474_v15, %v1289_v21  ;;  %v2692_v15 = vld [vmem:[#allocation3 + $0x130] sm:$0xff]  ;;  %v2693_v21 = vld [vmem:[#allocation3 + $0x148] sm:$0xff] }
 0x333   :  { %v2477_v61 = vpop.f32.mrb[92].mxu1  ;;  %2642 = vmatpush1.bf16.msra.mxu0 %v2641_v1  ;;  %v2694_v1 = vld [vmem:[#allocation3 + $0x140] sm:$0xff] }
 0x334   :  { %v1299_v36 = vpop.f32.mrb[93].mxu1  ;;  %2643 = vmatprep.subr.bf16.mxu0 %v4076_v19 }
 0x335   :  { %v2644_v35 = vpack.c.bf16 %v2477_v61, %v1299_v36  ;;  %v2695_v61 = vld [vmem:[#allocation3 + $0x158] sm:$0xff]  ;;  %v4093_v36 = vld [vmem:[#allocation6_spill] sm:$0xff] }
 0x337   :  { %v2480_v57 = vpop.f32.mrb[94].mxu1  ;;  %2645 = vmatpush1.bf16.msra.mxu0 %v2644_v35  ;;  %v4094_v35 = vld [vmem:[#allocation7_spill] sm:$0xff] }
 0x338   :  { %v1309_v30 = vpop.f32.mrb[95].mxu1  ;;  %2646 = vmatprep.subr.bf16.mxu0 %v4076_v19 }
 0x339   :  { %v2647_v42 = vpack.c.bf16 %v2480_v57, %v1309_v30  ;;  %v4095_v57 = vld [vmem:[#allocation8_spill] sm:$0xff]  ;;  %v4096_v30 = vld [vmem:[#allocation9_spill] sm:$0xff] }
 0x33b   :  { %v3553_v40 = vpop.f32.mrb[96].mxu1  ;;  %2648 = vmatpush1.bf16.msra.mxu0 %v2647_v42  ;;  %v4097_v42 = vld [vmem:[#allocation10_spill] sm:$0xff] }
 0x33c   :  { %v3555_v9 = vpop.f32.mrb[97].mxu1 }
 0x33e   :  { %1612 = vmatmul.mubr.f32.vlgmr.msra.gmra.mrb[64].mxu0 %v3025_v25 }
 0x33f   :  { %v3558_v46 = vpop.f32.mrb[98].mxu1  ;;  %1616 = vmatprep.mubr.f32.mxu0 %v3027_v27 }
 0x340   :  { %v3561_v63 = vpop.f32.mrb[99].mxu1 }
 0x342   :  { %1617 = vmatmul.mubr.f32.gmra.mrb[66].mxu0 %v3032_v29 }
 0x343   :  { %v3564_v6 = vpop.f32.mrb[100].mxu1  ;;  %1621 = vmatprep.mubr.f32.mxu0 %v3034_v31 }
 0x344   :  { %v3567_v19 = vpop.f32.mrb[101].mxu1 }
 0x346   :  { %1622 = vmatmul.mubr.f32.gmra.mrb[68].mxu0 %v3038_v33 }
 0x347   :  { %v3570_v5 = vpop.f32.mrb[102].mxu1  ;;  %1626 = vmatprep.mubr.f32.mxu0 %v3040_v37 }
 0x348   :  { %v3573_v25 = vpop.f32.mrb[103].mxu1 }
 0x34a   :  { %1627 = vmatmul.mubr.f32.gmra.mrb[70].mxu0 %v3044_v39 }
 0x34b   :  { %v3576_v27 = vpop.f32.mrb[104].mxu1  ;;  %1631 = vmatprep.mubr.f32.mxu0 %v3046_v41 }
 0x34c   :  { %v3579_v29 = vpop.f32.mrb[105].mxu1 }
 0x34e   :  { %1632 = vmatmul.mubr.f32.gmra.mrb[72].mxu0 %v3050_v43 }
 0x34f   :  { %v3582_v31 = vpop.f32.mrb[106].mxu1  ;;  %1636 = vmatprep.mubr.f32.mxu0 %v3052_v45 }
 0x350   :  { %v3585_v33 = vpop.f32.mrb[107].mxu1 }
 0x352   :  { %1637 = vmatmul.mubr.f32.gmra.mrb[74].mxu0 %v3056_v47 }
 0x353   :  { %v3588_v37 = vpop.f32.mrb[108].mxu1  ;;  %1641 = vmatprep.mubr.f32.mxu0 %v3060_v49 }
 0x354   :  { %v3591_v39 = vpop.f32.mrb[109].mxu1 }
 0x356   :  { %1642 = vmatmul.mubr.f32.gmra.mrb[76].mxu0 %v3072_v53 }
 0x357   :  { %v3594_v41 = vpop.f32.mrb[110].mxu1  ;;  %1646 = vmatprep.mubr.f32.mxu0 %v3076_v55 }
 0x358   :  { %v3597_v43 = vpop.f32.mrb[111].mxu1 }
 0x35a   :  { %1647 = vmatmul.mubr.f32.gmra.mrb[78].mxu0 %v3088_v59 }
 0x35b   :  { %v3600_v45 = vpop.f32.mrb[112].mxu1  ;;  %1651 = vmatprep.mubr.f32.mxu0 %v4077_v12  ;;  %v4098_v12 = vld [vmem:[#allocation12_spill] sm:$0xff] }
 0x35c   :  { %v3603_v47 = vpop.f32.mrb[113].mxu1 }
 0x35e   :  { %1652 = vmatmul.mubr.f32.gmra.mrb[80].mxu0 %v4078_v11  ;;  %v4099_v11 = vld [vmem:[#allocation14_spill] sm:$0xff] }
 0x35f   :  { %v3606_v49 = vpop.f32.mrb[114].mxu1  ;;  %1656 = vmatprep.mubr.f32.mxu0 %v4079_v62  ;;  %v4100_v62 = vld [vmem:[#allocation16_spill] sm:$0xff] }
 0x360   :  { %v3609_v53 = vpop.f32.mrb[115].mxu1 }
 0x362   :  { %1657 = vmatmul.mubr.f32.gmra.mrb[82].mxu0 %v4080_v18  ;;  %v4101_v18 = vld [vmem:[#allocation18_spill] sm:$0xff] }
 0x363   :  { %v3612_v55 = vpop.f32.mrb[116].mxu1  ;;  %1661 = vmatprep.mubr.f32.mxu0 %v4081_v56  ;;  %v4102_v56 = vld [vmem:[#allocation20_spill] sm:$0xff] }
 0x364   :  { %v3615_v59 = vpop.f32.mrb[117].mxu1 }
 0x366   :  { %1662 = vmatmul.mubr.f32.gmra.mrb[84].mxu0 %v4082_v17  ;;  %v4103_v17 = vld [vmem:[#allocation22_spill] sm:$0xff] }
 0x367   :  { %v3618_v60 = vpop.f32.mrb[118].mxu1  ;;  %1666 = vmatprep.mubr.f32.mxu0 %v4083_v50  ;;  %v4104_v50 = vld [vmem:[#allocation24_spill] sm:$0xff] }
 0x368   :  { %v3621_v22 = vpop.f32.mrb[119].mxu1 }
 0x36a   :  { %1667 = vmatmul.mubr.f32.gmra.mrb[86].mxu0 %v4084_v38  ;;  %v4105_v38 = vld [vmem:[#allocation26_spill] sm:$0xff] }
 0x36b   :  { %v3624_v48 = vpop.f32.mrb[120].mxu1  ;;  %1671 = vmatprep.mubr.f32.mxu0 %v4085_v13  ;;  %v4106_v13 = vld [vmem:[#allocation28_spill] sm:$0xff] }
 0x36c   :  { %v3627_v58 = vpop.f32.mrb[121].mxu1 }
 0x36e   :  { %1672 = vmatmul.mubr.f32.gmra.mrb[88].mxu0 %v4086_v23  ;;  %v4107_v23 = vld [vmem:[#allocation30_spill] sm:$0xff] }
 0x36f   :  { %v3630_v54 = vpop.f32.mrb[122].mxu1  ;;  %1676 = vmatprep.mubr.f32.mxu0 %v4087_v4  ;;  %v4108_v4 = vld [vmem:[#allocation32_spill] sm:$0xff] }
 0x370   :  { %v3633_v52 = vpop.f32.mrb[123].mxu1 }
 0x372   :  { %1677 = vmatmul.mubr.f32.gmra.mrb[90].mxu0 %v4088_v10  ;;  %v4109_v10 = vld [vmem:[#allocation34_spill] sm:$0xff] }
 0x373   :  { %v3636_v34 = vpop.f32.mrb[124].mxu1  ;;  %1681 = vmatprep.mubr.f32.mxu0 %v4089_v20  ;;  %v4110_v20 = vld [vmem:[#allocation36_spill] sm:$0xff] }
 0x374   :  { %v3639_v26 = vpop.f32.mrb[125].mxu1 }
 0x376   :  { %1682 = vmatmul.mubr.f32.gmra.mrb[92].mxu0 %v4090_v24  ;;  %v4111_v24 = vld [vmem:[#allocation38_spill] sm:$0xff] }
 0x377   :  { %v3642_v14 = vpop.f32.mrb[126].mxu1  ;;  %1686 = vmatprep.mubr.f32.mxu0 %v4091_v28  ;;  %v4112_v28 = vld [vmem:[#allocation40_spill] sm:$0xff] }
 0x378   :  { %v3645_v7 = vpop.f32.mrb[127].mxu1 }
 0x37a   :  { %1687 = vmatmul.mubr.f32.gmra.mrb[94].mxu0 %v4092_v51  ;;  %v4113_v51 = vld [vmem:[#allocation42_spill] sm:$0xff] }
 0x37b   :  { %1691 = vmatprep.mubr.f32.mxu0 %v2685_v44 }
 0x37e   :  { %1692 = vmatmul.mubr.f32.gmra.mrb[96].mxu0 %v2686_v3  ;;  %v3672_v3 = vld [vmem:[%s3976_s7] ss:$0 sm:$0xff] }
 0x37f   :  { %1696 = vmatprep.mubr.f32.mxu0 %v2687_v0 }
 0x382   :  { %1697 = vmatmul.mubr.f32.gmra.mrb[98].mxu0 %v2688_v8 }
 0x383   :  { %1701 = vmatprep.mubr.f32.mxu0 %v2689_v2 }
 0x386   :  { %1702 = vmatmul.mubr.f32.gmra.mrb[100].mxu0 %v2690_v32 }
 0x387   :  { %1706 = vmatprep.mubr.f32.mxu0 %v2691_v16  ;;  %v3679_v16 = vld [vmem:[%s3977_s8] ss:$0 sm:$0xff] }
 0x38a   :  { %1707 = vmatmul.mubr.f32.gmra.mrb[102].mxu0 %v2692_v15 }
 0x38b   :  { %1711 = vmatprep.mubr.f32.mxu0 %v2693_v21 }
 0x38e   :  { %1712 = vmatmul.mubr.f32.gmra.mrb[104].mxu0 %v2694_v1 }
 0x38f   :  { %1716 = vmatprep.mubr.f32.mxu0 %v2695_v61 }
 0x392   :  { %1717 = vmatmul.mubr.f32.gmra.mrb[106].mxu0 %v4093_v36 }
 0x393   :  { %1721 = vmatprep.mubr.f32.mxu0 %v4094_v35 }
 0x396   :  { %1722 = vmatmul.mubr.f32.gmra.mrb[108].mxu0 %v4095_v57 }
 0x397   :  { %1726 = vmatprep.mubr.f32.mxu0 %v4096_v30 }
 0x39a   :  { %1727 = vmatmul.mubr.f32.gmra.mrb[110].mxu0 %v4097_v42 }
 0x39b   :  { %1731 = vmatprep.mubr.f32.mxu0 %v4098_v12 }
 0x39e   :  { %1732 = vmatmul.mubr.f32.gmra.mrb[112].mxu0 %v4099_v11 }
 0x39f   :  { %1736 = vmatprep.mubr.f32.mxu0 %v4100_v62 }
 0x3a2   :  { %1737 = vmatmul.mubr.f32.gmra.mrb[114].mxu0 %v4101_v18 }
 0x3a3   :  { %1741 = vmatprep.mubr.f32.mxu0 %v4102_v56 }
 0x3a6   :  { %1742 = vmatmul.mubr.f32.gmra.mrb[116].mxu0 %v4103_v17 }
 0x3a7   :  { %1746 = vmatprep.mubr.f32.mxu0 %v4104_v50 }
 0x3aa   :  { %1747 = vmatmul.mubr.f32.gmra.mrb[118].mxu0 %v4105_v38 }
 0x3ab   :  { %1751 = vmatprep.mubr.f32.mxu0 %v4106_v13 }
 0x3ae   :  { %1752 = vmatmul.mubr.f32.gmra.mrb[120].mxu0 %v4107_v23 }
 0x3af   :  { %1756 = vmatprep.mubr.f32.mxu0 %v4108_v4 }
 0x3b2   :  { %1757 = vmatmul.mubr.f32.gmra.mrb[122].mxu0 %v4109_v10 }
 0x3b3   :  { %1761 = vmatprep.mubr.f32.mxu0 %v4110_v20 }
 0x3b6   :  { %1762 = vmatmul.mubr.f32.gmra.mrb[124].mxu0 %v4111_v24 }
 0x3b7   :  { %1766 = vmatprep.mubr.f32.mxu0 %v4112_v28 }
 0x3ba   :  { %1767 = vmatmul.mubr.f32.gmra.mrb[126].mxu0 %v4113_v51 }
 0x411   :  { %v1613_v44 = vpop.f32.mrb[64].mxu0 }
 0x412   :  { %v1614_v0 = vadd.f32 %v1613_v44, %v3555_v9  ;;  %v1615_v8 = vpop.f32.mrb[65].mxu0 }
 0x414   :  { %v1779_v2 = vadd.f32 %v3672_v3, %v1614_v0 }
 0x415   :  { %v1618_v32 = vpop.f32.mrb[66].mxu0 }
 0x416   :  { %v1811_v15 = vmax.f32 %v1779_v2, 0.0  ;;  %v1619_v21 = vadd.f32 %v3553_v40, %v1618_v32  ;;  %v1620_v1 = vpop.f32.mrb[67].mxu0 }
 0x418   :  { %v1780_v61 = vadd.f32 %v3672_v3, %v1619_v21  ;;  %v1850_v36 = vmul.f32 %v3679_v16, %v1811_v15 }
 0x419   :  { %v1623_v35 = vpop.f32.mrb[68].mxu0 }
 0x41a   :  { %v1812_v57 = vmax.f32 %v1780_v61, 0.0  ;;  %v1624_v9 = vadd.f32 %v1623_v35, %v3561_v63  ;;  %v1625_v30 = vpop.f32.mrb[69].mxu0  ;;  %v1882_v42 = vsel %vm996_vm1, %v1850_v36, 0.0 }
 0x41b   :  { %1883 = vadd.xlane.f32.xlu0 %v1882_v42 }
 0x41c   :  { %v1781_v12 = vadd.f32 %v3672_v3, %v1624_v9  ;;  %v1851_v11 = vmul.f32 %v3679_v16, %v1812_v57 }
 0x41d   :  { %v1628_v62 = vpop.f32.mrb[70].mxu0 }
 0x41e   :  { %v1813_v18 = vmax.f32 %v1781_v12, 0.0  ;;  %v1629_v40 = vadd.f32 %v3558_v46, %v1628_v62  ;;  %v1630_v56 = vpop.f32.mrb[71].mxu0  ;;  %v1885_v17 = vsel %vm996_vm1, %v1851_v11, 0.0 }
 0x41f   :  { %1886 = vadd.xlane.f32.xlu0 %v1885_v17 }
 0x420   :  { %v1782_v50 = vadd.f32 %v3672_v3, %v1629_v40  ;;  %v1852_v63 = vmul.f32 %v3679_v16, %v1813_v18 }
 0x421   :  { %v1633_v38 = vpop.f32.mrb[72].mxu0 }
 0x422   :  { %v1814_v13 = vmax.f32 %v1782_v50, 0.0  ;;  %v1634_v23 = vadd.f32 %v1633_v38, %v3567_v19  ;;  %v1635_v4 = vpop.f32.mrb[73].mxu0  ;;  %v1888_v10 = vsel %vm996_vm1, %v1852_v63, 0.0 }
 0x423   :  { %1889 = vadd.xlane.f32.xlu1 %v1888_v10 }
 0x424   :  { %v1783_v20 = vadd.f32 %v3672_v3, %v1634_v23  ;;  %v1853_v46 = vmul.f32 %v3679_v16, %v1814_v13 }
 0x425   :  { %v1638_v24 = vpop.f32.mrb[74].mxu0 }
 0x426   :  { %v1815_v28 = vmax.f32 %v1783_v20, 0.0  ;;  %v1639_v51 = vadd.f32 %v3564_v6, %v1638_v24  ;;  %v1640_v44 = vpop.f32.mrb[75].mxu0  ;;  %v1891_v0 = vsel %vm996_vm1, %v1853_v46, 0.0 }
 0x427   :  { %1892 = vadd.xlane.f32.xlu1 %v1891_v0 }
 0x428   :  { %v1784_v8 = vadd.f32 %v3672_v3, %v1639_v51  ;;  %v1854_v19 = vmul.f32 %v3679_v16, %v1815_v28 }
 0x429   :  { %v1643_v2 = vpop.f32.mrb[76].mxu0 }
 0x42a   :  { %v1816_v32 = vmax.f32 %v1784_v8, 0.0  ;;  %v1644_v15 = vadd.f32 %v1643_v2, %v3573_v25  ;;  %v1645_v21 = vpop.f32.mrb[77].mxu0  ;;  %v1894_v1 = vsel %vm996_vm1, %v1854_v19, 0.0 }
 0x42b   :  { %1895 = vadd.xlane.f32.xlu0 %v1894_v1 }
 0x42c   :  { %v1785_v61 = vadd.f32 %v3672_v3, %v1644_v15  ;;  %v1855_v6 = vmul.f32 %v3679_v16, %v1816_v32 }
 0x42d   :  { %v1648_v36 = vpop.f32.mrb[78].mxu0 }
 0x42e   :  { %v1817_v35 = vmax.f32 %v1785_v61, 0.0  ;;  %v1649_v57 = vadd.f32 %v3570_v5, %v1648_v36  ;;  %v1650_v9 = vpop.f32.mrb[79].mxu0  ;;  %v1897_v30 = vsel %vm996_vm1, %v1855_v6, 0.0 }
 0x42f   :  { %1898 = vadd.xlane.f32.xlu1 %v1897_v30 }
 0x430   :  { %v1786_v42 = vadd.f32 %v3672_v3, %v1649_v57  ;;  %v1856_v25 = vmul.f32 %v3679_v16, %v1817_v35 }
 0x431   :  { %v1653_v12 = vpop.f32.mrb[80].mxu0 }
 0x432   :  { %v1818_v11 = vmax.f32 %v1786_v42, 0.0  ;;  %v1654_v62 = vadd.f32 %v1653_v12, %v3579_v29  ;;  %v1655_v18 = vpop.f32.mrb[81].mxu0  ;;  %v1900_v40 = vsel %vm996_vm1, %v1856_v25, 0.0 }
 0x433   :  { %1901 = vadd.xlane.f32.xlu0 %v1900_v40 }
 0x434   :  { %v1787_v56 = vadd.f32 %v3672_v3, %v1654_v62  ;;  %v1857_v5 = vmul.f32 %v3679_v16, %v1818_v11 }
 0x435   :  { %v1658_v17 = vpop.f32.mrb[82].mxu0 }
 0x436   :  { %v1819_v50 = vmax.f32 %v1787_v56, 0.0  ;;  %v1659_v63 = vadd.f32 %v3576_v27, %v1658_v17  ;;  %v1660_v38 = vpop.f32.mrb[83].mxu0  ;;  %v1903_v13 = vsel %vm996_vm1, %v1857_v5, 0.0 }
 0x437   :  { %1904 = vadd.xlane.f32.xlu1 %v1903_v13 }
 0x438   :  { %v1788_v23 = vadd.f32 %v3672_v3, %v1659_v63  ;;  %v1858_v29 = vmul.f32 %v3679_v16, %v1819_v50 }
 0x439   :  { %v1663_v4 = vpop.f32.mrb[84].mxu0 }
 0x43a   :  { %v1820_v10 = vmax.f32 %v1788_v23, 0.0  ;;  %v1664_v20 = vadd.f32 %v1663_v4, %v3585_v33  ;;  %v1665_v46 = vpop.f32.mrb[85].mxu0  ;;  %v1906_v24 = vsel %vm996_vm1, %v1858_v29, 0.0 }
 0x43b   :  { %1907 = vadd.xlane.f32.xlu0 %v1906_v24 }
 0x43c   :  { %v1789_v28 = vadd.f32 %v3672_v3, %v1664_v20  ;;  %v1859_v27 = vmul.f32 %v3679_v16, %v1820_v10 }
 0x43d   :  { %v1668_v51 = vpop.f32.mrb[86].mxu0 }
 0x43e   :  { %v1821_v44 = vmax.f32 %v1789_v28, 0.0  ;;  %v1669_v0 = vadd.f32 %v3582_v31, %v1668_v51  ;;  %v1670_v8 = vpop.f32.mrb[87].mxu0  ;;  %v1909_v19 = vsel %vm996_vm1, %v1859_v27, 0.0 }
 0x43f   :  { %1910 = vadd.xlane.f32.xlu1 %v1909_v19 }
 0x440   :  { %v1790_v2 = vadd.f32 %v3672_v3, %v1669_v0  ;;  %v1860_v33 = vmul.f32 %v3679_v16, %v1821_v44 }
 0x441   :  { %v1673_v32 = vpop.f32.mrb[88].mxu0 }
 0x442   :  { %v1822_v15 = vmax.f32 %v1790_v2, 0.0  ;;  %v1674_v21 = vadd.f32 %v1673_v32, %v3591_v39  ;;  %v1675_v1 = vpop.f32.mrb[89].mxu0  ;;  %v1912_v61 = vsel %vm996_vm1, %v1860_v33, 0.0 }
 0x443   :  { %1913 = vadd.xlane.f32.xlu0 %v1912_v61 }
 0x444   :  { %v1791_v6 = vadd.f32 %v3672_v3, %v1674_v21  ;;  %v1861_v31 = vmul.f32 %v3679_v16, %v1822_v15 }
 0x445   :  { %v1678_v36 = vpop.f32.mrb[90].mxu0 }
 0x446   :  { %v1823_v35 = vmax.f32 %v1791_v6, 0.0  ;;  %v1679_v57 = vadd.f32 %v3588_v37, %v1678_v36  ;;  %v1680_v9 = vpop.f32.mrb[91].mxu0  ;;  %v1915_v30 = vsel %vm996_vm1, %v1861_v31, 0.0 }
 0x447   :  { %1916 = vadd.xlane.f32.xlu1 %v1915_v30 }
 0x448   :  { %v1792_v42 = vadd.f32 %v3672_v3, %v1679_v57  ;;  %v1862_v39 = vmul.f32 %v3679_v16, %v1823_v35 }
 0x449   :  { %v1683_v25 = vpop.f32.mrb[92].mxu0 }
 0x44a   :  { %v1824_v12 = vmax.f32 %v1792_v42, 0.0  ;;  %v1684_v11 = vadd.f32 %v1683_v25, %v3597_v43  ;;  %v1685_v62 = vpop.f32.mrb[93].mxu0  ;;  %v1918_v18 = vsel %vm996_vm1, %v1862_v39, 0.0 }
 0x44b   :  { %1919 = vadd.xlane.f32.xlu0 %v1918_v18 }
 0x44c   :  { %v1793_v40 = vadd.f32 %v3672_v3, %v1684_v11  ;;  %v1863_v37 = vmul.f32 %v3679_v16, %v1824_v12 }
 0x44d   :  { %v1688_v56 = vpop.f32.mrb[94].mxu0 }
 0x44e   :  { %v1825_v5 = vmax.f32 %v1793_v40, 0.0  ;;  %v1689_v17 = vadd.f32 %v3594_v41, %v1688_v56  ;;  %v1690_v50 = vpop.f32.mrb[95].mxu0  ;;  %v1921_v63 = vsel %vm996_vm1, %v1863_v37, 0.0 }
 0x44f   :  { %1922 = vadd.xlane.f32.xlu1 %v1921_v63 }
 0x450   :  { %v1794_v38 = vadd.f32 %v3672_v3, %v1689_v17  ;;  %v1864_v43 = vmul.f32 %v3679_v16, %v1825_v5 }
 0x451   :  { %v1693_v13 = vpop.f32.mrb[96].mxu0 }
 0x452   :  { %v1826_v23 = vmax.f32 %v1794_v38, 0.0  ;;  %v1694_v29 = vadd.f32 %v1693_v13, %v3603_v47  ;;  %v1695_v4 = vpop.f32.mrb[97].mxu0  ;;  %v1924_v10 = vsel %vm996_vm1, %v1864_v43, 0.0 }
 0x453   :  { %1925 = vadd.xlane.f32.xlu0 %v1924_v10 }
 0x454   :  { %v1795_v20 = vadd.f32 %v3672_v3, %v1694_v29  ;;  %v1865_v41 = vmul.f32 %v3679_v16, %v1826_v23 }
 0x455   :  { %v1698_v46 = vpop.f32.mrb[98].mxu0 }
 0x456   :  { %v1827_v24 = vmax.f32 %v1795_v20, 0.0  ;;  %v1699_v28 = vadd.f32 %v3600_v45, %v1698_v46  ;;  %v1700_v27 = vpop.f32.mrb[99].mxu0  ;;  %v1927_v51 = vsel %vm996_vm1, %v1865_v41, 0.0 }
 0x457   :  { %1928 = vadd.xlane.f32.xlu1 %v1927_v51 }
 0x458   :  { %v1796_v44 = vadd.f32 %v3672_v3, %v1699_v28  ;;  %v1866_v47 = vmul.f32 %v3679_v16, %v1827_v24 }
 0x459   :  { %v1703_v0 = vpop.f32.mrb[100].mxu0 }
 0x45a   :  { %v1828_v8 = vmax.f32 %v1796_v44, 0.0  ;;  %v1704_v19 = vadd.f32 %v1703_v0, %v3609_v53  ;;  %v1705_v2 = vpop.f32.mrb[101].mxu0  ;;  %v1930_v33 = vsel %vm996_vm1, %v1866_v47, 0.0 }
 0x45b   :  { %1931 = vadd.xlane.f32.xlu0 %v1930_v33 }
 0x45c   :  { %v1797_v32 = vadd.f32 %v3672_v3, %v1704_v19  ;;  %v1867_v45 = vmul.f32 %v3679_v16, %v1828_v8 }
 0x45d   :  { %v1708_v15 = vpop.f32.mrb[102].mxu0 }
 0x45e   :  { %v1829_v21 = vmax.f32 %v1797_v32, 0.0  ;;  %v1709_v1 = vadd.f32 %v3606_v49, %v1708_v15  ;;  %v1710_v61 = vpop.f32.mrb[103].mxu0  ;;  %v1933_v6 = vsel %vm996_vm1, %v1867_v45, 0.0 }
 0x45f   :  { %1934 = vadd.xlane.f32.xlu1 %v1933_v6 }
 0x460   :  { %v1798_v31 = vadd.f32 %v3672_v3, %v1709_v1  ;;  %v1868_v53 = vmul.f32 %v3679_v16, %v1829_v21 }
 0x461   :  { %v1713_v36 = vpop.f32.mrb[104].mxu0 }
 0x462   :  { %v1830_v35 = vmax.f32 %v1798_v31, 0.0  ;;  %v1714_v57 = vadd.f32 %v1713_v36, %v3615_v59  ;;  %v1715_v9 = vpop.f32.mrb[105].mxu0  ;;  %v1936_v30 = vsel %vm996_vm1, %v1868_v53, 0.0 }
 0x463   :  { %1937 = vadd.xlane.f32.xlu0 %v1936_v30 }
 0x464   :  { %v1799_v42 = vadd.f32 %v3672_v3, %v1714_v57  ;;  %v1869_v49 = vmul.f32 %v3679_v16, %v1830_v35 }
 0x465   :  { %v1718_v39 = vpop.f32.mrb[106].mxu0 }
 0x466   :  { %v1831_v25 = vmax.f32 %v1799_v42, 0.0  ;;  %v1719_v12 = vadd.f32 %v3612_v55, %v1718_v39  ;;  %v1720_v11 = vpop.f32.mrb[107].mxu0  ;;  %v1939_v62 = vsel %vm996_vm1, %v1869_v49, 0.0 }
 0x467   :  { %1940 = vadd.xlane.f32.xlu1 %v1939_v62 }
 0x468   :  { %v1800_v18 = vadd.f32 %v3672_v3, %v1719_v12  ;;  %v1870_v59 = vmul.f32 %v3679_v16, %v1831_v25 }
 0x469   :  { %v1723_v40 = vpop.f32.mrb[108].mxu0 }
 0x46a   :  { %v1832_v37 = vmax.f32 %v1800_v18, 0.0  ;;  %v1724_v56 = vadd.f32 %v1723_v40, %v3621_v22  ;;  %v1725_v5 = vpop.f32.mrb[109].mxu0  ;;  %v1942_v17 = vsel %vm996_vm1, %v1870_v59, 0.0 }
 0x46b   :  { %1943 = vadd.xlane.f32.xlu0 %v1942_v17 }
 0x46c   :  { %v1801_v50 = vadd.f32 %v3672_v3, %v1724_v56  ;;  %v1871_v55 = vmul.f32 %v3679_v16, %v1832_v37 }
 0x46d   :  { %v1728_v63 = vpop.f32.mrb[110].mxu0 }
 0x46e   :  { %v1833_v38 = vmax.f32 %v1801_v50, 0.0  ;;  %v1729_v43 = vadd.f32 %v3618_v60, %v1728_v63  ;;  %v1730_v13 = vpop.f32.mrb[111].mxu0  ;;  %v1945_v23 = vsel %vm996_vm1, %v1871_v55, 0.0 }
 0x46f   :  { %1946 = vadd.xlane.f32.xlu1 %v1945_v23 }
 0x470   :  { %v1802_v29 = vadd.f32 %v3672_v3, %v1729_v43  ;;  %v1872_v22 = vmul.f32 %v3679_v16, %v1833_v38 }
 0x471   :  { %v1733_v4 = vpop.f32.mrb[112].mxu0 }
 0x472   :  { %v1834_v10 = vmax.f32 %v1802_v29, 0.0  ;;  %v1734_v20 = vadd.f32 %v1733_v4, %v3627_v58  ;;  %v1735_v41 = vpop.f32.mrb[113].mxu0  ;;  %v1948_v46 = vsel %vm996_vm1, %v1872_v22, 0.0  ;;  %v3807_v22 = vld [vmem:[#allocation2] ss:$0 sm:$0xff] }
 0x473   :  { %1949 = vadd.xlane.f32.xlu0 %v1948_v46 }
 0x474   :  { %v1803_v24 = vadd.f32 %v3672_v3, %v1734_v20  ;;  %v1873_v60 = vmul.f32 %v3679_v16, %v1834_v10 }
 0x475   :  { %v1738_v28 = vpop.f32.mrb[114].mxu0 }
 0x476   :  { %v1835_v27 = vmax.f32 %v1803_v24, 0.0  ;;  %v1739_v51 = vadd.f32 %v3624_v48, %v1738_v28  ;;  %v1740_v44 = vpop.f32.mrb[115].mxu0  ;;  %v1951_v47 = vsel %vm996_vm1, %v1873_v60, 0.0 }
 0x477   :  { %1952 = vadd.xlane.f32.xlu1 %v1951_v47 }
 0x478   :  { %v1804_v0 = vadd.f32 %v3672_v3, %v1739_v51  ;;  %v1874_v58 = vmul.f32 %v3679_v16, %v1835_v27 }
 0x479   :  { %v1743_v8 = vpop.f32.mrb[116].mxu0 }
 0x47a   :  { %v1836_v19 = vmax.f32 %v1804_v0, 0.0  ;;  %v1744_v2 = vadd.f32 %v1743_v8, %v3633_v52  ;;  %v1745_v33 = vpop.f32.mrb[117].mxu0  ;;  %v1954_v32 = vsel %vm996_vm1, %v1874_v58, 0.0 }
 0x47b   :  { %1955 = vadd.xlane.f32.xlu0 %v1954_v32 }
 0x47c   :  { %v1805_v45 = vadd.f32 %v3672_v3, %v1744_v2  ;;  %v1875_v48 = vmul.f32 %v3679_v16, %v1836_v19 }
 0x47d   :  { %v1748_v15 = vpop.f32.mrb[118].mxu0 }
 0x47e   :  { %v1837_v21 = vmax.f32 %v1805_v45, 0.0  ;;  %v1749_v1 = vadd.f32 %v3630_v54, %v1748_v15  ;;  %v1750_v61 = vpop.f32.mrb[119].mxu0  ;;  %v1957_v6 = vsel %vm996_vm1, %v1875_v48, 0.0 }
 0x47f   :  { %1958 = vadd.xlane.f32.xlu1 %v1957_v6 }
 0x480   :  { %v1806_v31 = vadd.f32 %v3672_v3, %v1749_v1  ;;  %v1876_v52 = vmul.f32 %v3679_v16, %v1837_v21 }
 0x481   :  { %v1753_v53 = vpop.f32.mrb[120].mxu0 }
 0x482   :  { %v1838_v36 = vmax.f32 %v1806_v31, 0.0  ;;  %v1754_v35 = vadd.f32 %v1753_v53, %v3639_v26  ;;  %v1755_v57 = vpop.f32.mrb[121].mxu0  ;;  %v1960_v9 = vsel %vm996_vm1, %v1876_v52, 0.0 }
 0x483   :  { %1961 = vadd.xlane.f32.xlu0 %v1960_v9 }
 0x484   :  { %v1807_v30 = vadd.f32 %v3672_v3, %v1754_v35  ;;  %v1877_v54 = vmul.f32 %v3679_v16, %v1838_v36 }
 0x485   :  { %v1758_v42 = vpop.f32.mrb[122].mxu0 }
 0x486   :  { %v1839_v49 = vmax.f32 %v1807_v30, 0.0  ;;  %v1759_v39 = vadd.f32 %v3636_v34, %v1758_v42  ;;  %v1760_v25 = vpop.f32.mrb[123].mxu0  ;;  %v1963_v12 = vsel %vm996_vm1, %v1877_v54, 0.0 }
 0x487   :  { %1964 = vadd.xlane.f32.xlu1 %v1963_v12 }
 0x488   :  { %v1808_v11 = vadd.f32 %v3672_v3, %v1759_v39  ;;  %v1878_v26 = vmul.f32 %v3679_v16, %v1839_v49 }
 0x489   :  { %v1763_v62 = vpop.f32.mrb[124].mxu0 }
 0x48a   :  { %v1840_v18 = vmax.f32 %v1808_v11, 0.0  ;;  %v1764_v59 = vadd.f32 %v1763_v62, %v3645_v7  ;;  %v1765_v40 = vpop.f32.mrb[125].mxu0  ;;  %v1966_v37 = vsel %vm996_vm1, %v1878_v26, 0.0 }
 0x48b   :  { %1967 = vadd.xlane.f32.xlu0 %v1966_v37 }
 0x48c   :  { %v1809_v56 = vadd.f32 %v3672_v3, %v1764_v59  ;;  %v1879_v34 = vmul.f32 %v3679_v16, %v1840_v18 }
 0x48d   :  { %v1768_v5 = vpop.f32.mrb[126].mxu0 }
 0x48e   :  { %v1841_v17 = vmax.f32 %v1809_v56, 0.0  ;;  %v1769_v50 = vadd.f32 %v3642_v14, %v1768_v5  ;;  %v1770_v55 = vpop.f32.mrb[127].mxu0  ;;  %v1969_v63 = vsel %vm996_vm1, %v1879_v34, 0.0 }
 0x48f   :  { %1970 = vadd.xlane.f32.xlu1 %v1969_v63 }
 0x490   :  { %v1810_v38 = vadd.f32 %v3672_v3, %v1769_v50  ;;  %v1880_v7 = vmul.f32 %v3679_v16, %v1841_v17 }
 0x492   :  { %v1842_v43 = vmax.f32 %v1810_v38, 0.0  ;;  %v1972_v13 = vsel %vm996_vm1, %v1880_v7, 0.0 }
 0x493   :  { %1973 = vadd.xlane.f32.xlu0 %v1972_v13 }
 0x494   :  { %v1881_v23 = vmul.f32 %v3679_v16, %v1842_v43 }
 0x496   :  { %v1975_v29 = vsel %vm996_vm1, %v1881_v23, 0.0 }
 0x497   :  { %1976 = vadd.xlane.f32.xlu1 %v1975_v29 }
 0x4a8   :  { %v1884_v14 = vpop.xlane.xlu0 %1883 }
 0x4a9   :  { %v1985_v4 = vadd.f32 %v3807_v22, %v1884_v14 }
 0x4ab   :  { %2018 = vst.msk [vmem:[%s3979_s10] sm:$0xff] %vm2017_vm2, %v1985_v4 }
 0x4ac   :  { %v1887_v3 = vpop.xlane.xlu0 %1886 }
 0x4ad   :  { %v1986_v10 = vadd.f32 %v3807_v22, %v1887_v3 }
 0x4af   :  { %2019 = vst.msk [vmem:[%s3979_s10 + $0x8] sm:$0xff] %vm2017_vm2, %v1986_v10 }
 0x4b0   :  { %v1890_v16 = vpop.xlane.xlu1 %1889 }
 0x4b1   :  { %v1987_v20 = vadd.f32 %v3807_v22, %v1890_v16 }
 0x4b3   :  { %2020 = vst.msk [vmem:[%s3979_s10 + $0x10] sm:$0xff] %vm2017_vm2, %v1987_v20 }
 0x4b4   :  { %v1893_v41 = vpop.xlane.xlu1 %1892 }
 0x4b5   :  { %v1988_v46 = vadd.f32 %v3807_v22, %v1893_v41 }
 0x4b7   :  { %2021 = vst.msk [vmem:[%s3979_s10 + $0x18] sm:$0xff] %vm2017_vm2, %v1988_v46 }
 0x4b8   :  { %v1896_v24 = vpop.xlane.xlu0 %1895 }
 0x4b9   :  { %v1989_v60 = vadd.f32 %v3807_v22, %v1896_v24 }
 0x4bb   :  { %2022 = vst.msk [vmem:[%s3979_s10 + $0x20] sm:$0xff] %vm2017_vm2, %v1989_v60 }
 0x4bc   :  { %v1899_v28 = vpop.xlane.xlu1 %1898 }
 0x4bd   :  { %v1990_v27 = vadd.f32 %v3807_v22, %v1899_v28 }
 0x4bf   :  { %2023 = vst.msk [vmem:[%s3979_s10 + $0x28] sm:$0xff] %vm2017_vm2, %v1990_v27 }
 0x4c0   :  { %v1902_v51 = vpop.xlane.xlu0 %1901 }
 0x4c1   :  { %v1991_v44 = vadd.f32 %v3807_v22, %v1902_v51 }
 0x4c3   :  { %2024 = vst.msk [vmem:[%s3979_s10 + $0x30] sm:$0xff] %vm2017_vm2, %v1991_v44 }
 0x4c4   :  { %v1905_v47 = vpop.xlane.xlu1 %1904 }
 0x4c5   :  { %v1992_v0 = vadd.f32 %v3807_v22, %v1905_v47 }
 0x4c7   :  { %2025 = vst.msk [vmem:[%s3979_s10 + $0x38] sm:$0xff] %vm2017_vm2, %v1992_v0 }
 0x4c8   :  { %v1908_v58 = vpop.xlane.xlu0 %1907 }
 0x4c9   :  { %v1993_v8 = vadd.f32 %v3807_v22, %v1908_v58 }
 0x4cb   :  { %2026 = vst.msk [vmem:[%s3979_s10 + $0x40] sm:$0xff] %vm2017_vm2, %v1993_v8 }
 0x4cc   :  { %v1911_v19 = vpop.xlane.xlu1 %1910 }
 0x4cd   :  { %v1994_v2 = vadd.f32 %v3807_v22, %v1911_v19 }
 0x4cf   :  { %2027 = vst.msk [vmem:[%s3979_s10 + $0x48] sm:$0xff] %vm2017_vm2, %v1994_v2 }
 0x4d0   :  { %v1914_v33 = vpop.xlane.xlu0 %1913 }
 0x4d1   :  { %v1995_v32 = vadd.f32 %v3807_v22, %v1914_v33 }
 0x4d3   :  { %2028 = vst.msk [vmem:[%s3979_s10 + $0x50] sm:$0xff] %vm2017_vm2, %v1995_v32 }
 0x4d4   :  { %v1917_v45 = vpop.xlane.xlu1 %1916 }
 0x4d5   :  { %v1996_v48 = vadd.f32 %v3807_v22, %v1917_v45 }
 0x4d7   :  { %2029 = vst.msk [vmem:[%s3979_s10 + $0x58] sm:$0xff] %vm2017_vm2, %v1996_v48 }
 0x4d8   :  { %v1920_v15 = vpop.xlane.xlu0 %1919 }
 0x4d9   :  { %v1997_v21 = vadd.f32 %v3807_v22, %v1920_v15 }
 0x4db   :  { %2030 = vst.msk [vmem:[%s3979_s10 + $0x60] sm:$0xff] %vm2017_vm2, %v1997_v21 }
 0x4dc   :  { %v1923_v1 = vpop.xlane.xlu1 %1922 }
 0x4dd   :  { %v1998_v61 = vadd.f32 %v3807_v22, %v1923_v1 }
 0x4df   :  { %2031 = vst.msk [vmem:[%s3979_s10 + $0x68] sm:$0xff] %vm2017_vm2, %v1998_v61 }
 0x4e0   :  { %v1926_v6 = vpop.xlane.xlu0 %1925 }
 0x4e1   :  { %v1999_v31 = vadd.f32 %v3807_v22, %v1926_v6 }
 0x4e3   :  { %2032 = vst.msk [vmem:[%s3979_s10 + $0x70] sm:$0xff] %vm2017_vm2, %v1999_v31 }
 0x4e4   :  { %v1929_v52 = vpop.xlane.xlu1 %1928 }
 0x4e5   :  { %v2000_v53 = vadd.f32 %v3807_v22, %v1929_v52 }
 0x4e7   :  { %2033 = vst.msk [vmem:[%s3979_s10 + $0x78] sm:$0xff] %vm2017_vm2, %v2000_v53 }
 0x4e8   :  { %v1932_v36 = vpop.xlane.xlu0 %1931 }
 0x4e9   :  { %v2001_v35 = vadd.f32 %v3807_v22, %v1932_v36 }
 0x4eb   :  { %2034 = vst.msk [vmem:[%s3979_s10 + $0x80] sm:$0xff] %vm2017_vm2, %v2001_v35 }
 0x4ec   :  { %v1935_v57 = vpop.xlane.xlu1 %1934 }
 0x4ed   :  { %v2002_v9 = vadd.f32 %v3807_v22, %v1935_v57 }
 0x4ef   :  { %2035 = vst.msk [vmem:[%s3979_s10 + $0x88] sm:$0xff] %vm2017_vm2, %v2002_v9 }
 0x4f0   :  { %v1938_v30 = vpop.xlane.xlu0 %1937 }
 0x4f1   :  { %v2003_v54 = vadd.f32 %v3807_v22, %v1938_v30 }
 0x4f3   :  { %2036 = vst.msk [vmem:[%s3979_s10 + $0x90] sm:$0xff] %vm2017_vm2, %v2003_v54 }
 0x4f4   :  { %v1941_v42 = vpop.xlane.xlu1 %1940 }
 0x4f5   :  { %v2004_v49 = vadd.f32 %v3807_v22, %v1941_v42 }
 0x4f7   :  { %2037 = vst.msk [vmem:[%s3979_s10 + $0x98] sm:$0xff] %vm2017_vm2, %v2004_v49 }
 0x4f8   :  { %v1944_v39 = vpop.xlane.xlu0 %1943 }
 0x4f9   :  { %v2005_v25 = vadd.f32 %v3807_v22, %v1944_v39 }
 0x4fb   :  { %2038 = vst.msk [vmem:[%s3979_s10 + $0xa0] sm:$0xff] %vm2017_vm2, %v2005_v25 }
 0x4fc   :  { %v1947_v12 = vpop.xlane.xlu1 %1946 }
 0x4fd   :  { %v2006_v11 = vadd.f32 %v3807_v22, %v1947_v12 }
 0x4ff   :  { %2039 = vst.msk [vmem:[%s3979_s10 + $0xa8] sm:$0xff] %vm2017_vm2, %v2006_v11 }
 0x500   :  { %v1950_v26 = vpop.xlane.xlu0 %1949 }
 0x501   :  { %v2007_v62 = vadd.f32 %v3807_v22, %v1950_v26 }
 0x503   :  { %2040 = vst.msk [vmem:[%s3979_s10 + $0xb0] sm:$0xff] %vm2017_vm2, %v2007_v62 }
 0x504   :  { %v1953_v18 = vpop.xlane.xlu1 %1952 }
 0x505   :  { %v2008_v59 = vadd.f32 %v3807_v22, %v1953_v18 }
 0x507   :  { %2041 = vst.msk [vmem:[%s3979_s10 + $0xb8] sm:$0xff] %vm2017_vm2, %v2008_v59 }
 0x508   :  { %v1956_v40 = vpop.xlane.xlu0 %1955 }
 0x509   :  { %v2009_v37 = vadd.f32 %v3807_v22, %v1956_v40 }
 0x50b   :  { %2042 = vst.msk [vmem:[%s3979_s10 + $0xc0] sm:$0xff] %vm2017_vm2, %v2009_v37 }
 0x50c   :  { %v1959_v56 = vpop.xlane.xlu1 %1958 }
 0x50d   :  { %v2010_v34 = vadd.f32 %v3807_v22, %v1959_v56 }
 0x50f   :  { %2043 = vst.msk [vmem:[%s3979_s10 + $0xc8] sm:$0xff] %vm2017_vm2, %v2010_v34 }
 0x510   :  { %v1962_v5 = vpop.xlane.xlu0 %1961 }
 0x511   :  { %v2011_v17 = vadd.f32 %v3807_v22, %v1962_v5 }
 0x513   :  { %2044 = vst.msk [vmem:[%s3979_s10 + $0xd0] sm:$0xff] %vm2017_vm2, %v2011_v17 }
 0x514   :  { %v1965_v50 = vpop.xlane.xlu1 %1964 }
 0x515   :  { %v2012_v55 = vadd.f32 %v3807_v22, %v1965_v50 }
 0x517   :  { %2045 = vst.msk [vmem:[%s3979_s10 + $0xd8] sm:$0xff] %vm2017_vm2, %v2012_v55 }
 0x518   :  { %v1968_v63 = vpop.xlane.xlu0 %1967 }
 0x519   :  { %v2013_v38 = vadd.f32 %v3807_v22, %v1968_v63 }
 0x51b   :  { %2046 = vst.msk [vmem:[%s3979_s10 + $0xe0] sm:$0xff] %vm2017_vm2, %v2013_v38 }
 0x51c   :  { %v1971_v7 = vpop.xlane.xlu1 %1970 }
 0x51d   :  { %v2014_v43 = vadd.f32 %v3807_v22, %v1971_v7 }
 0x51f   :  { %2047 = vst.msk [vmem:[%s3979_s10 + $0xe8] sm:$0xff] %vm2017_vm2, %v2014_v43 }
 0x520   :  { %v1974_v13 = vpop.xlane.xlu0 %1973 }
 0x521   :  { %v2015_v23 = vadd.f32 %v3807_v22, %v1974_v13 }
 0x523   :  { %2048 = vst.msk [vmem:[%s3979_s10 + $0xf0] sm:$0xff] %vm2017_vm2, %v2015_v23 }
 0x524   :  { %v1977_v29 = vpop.xlane.xlu1 %1976 }
 0x525   :  { %v2016_v14 = vadd.f32 %v3807_v22, %v1977_v29 }
 0x527   :  { %2049 = vst.msk [vmem:[%s3979_s10 + $0xf8] sm:$0xff] %vm2017_vm2, %v2016_v14 }
 0x528   :  { %2054 = vsyncpa [#allocation4], 1 }

</bundles_post_ra>
